<compile_context>
chip_gen: v7x
topology: tpu7x:2x2x1
jax: 0.10.0
libtpu: 0.0.40
codegen_flags: <defaults>
</compile_context>

<pallas_src>
import functools
import math

import jax
import jax.numpy as jnp
from jax.experimental import pallas as pl
from jax.experimental.pallas import tpu as pltpu


_MASK_NEG = -1e9
_LN_EPS = 1e-6
_TILE_M_CAP = 512                  # rows per grid step for token-tiled kernels
_VMEM_LIMIT = 48 * 1024 * 1024     # explicit scoped-VMEM limit (headroom on v7x)


def _choose_tile_m(m, cap=_TILE_M_CAP):
    # Either the full dim (always legal) or a multiple-of-8 cap.
    return m if m <= cap else cap


def _w_spec(shape):
    """Grid-invariant (replicated) weight/bias block, single-buffered."""
    index_map = lambda *_: (0,) * len(shape)
    if hasattr(pl, "Buffered"):
        try:
            return pl.BlockSpec(shape, index_map,
                                pipeline_mode=pl.Buffered(buffer_count=1))
        except TypeError:
            pass
    return pl.BlockSpec(shape, index_map)


def _layernorm_f32(x, g, b, eps):
    """Annotated-transformer LayerNorm: unbiased std, eps added to std."""
    d = x.shape[-1]
    mean = jnp.mean(x, axis=-1, keepdims=True)
    var = jnp.sum((x - mean) ** 2, axis=-1, keepdims=True) / (d - 1)
    # Exact reciprocal here (numerics-sensitive); approx only in softmax.
    return g * (x - mean) / (jnp.sqrt(var) + eps) + b


# ----------------------------- fused kernels -----------------------------

def _embed_kernel(x_ref, w_ref, b_ref, o_ref):
    x = x_ref[...].astype(jnp.bfloat16)
    y = jnp.dot(x, w_ref[...], preferred_element_type=jnp.float32)
    o_ref[...] = (y + b_ref[...]).astype(o_ref.dtype)


def embed(x2d, w_bf16, b):
    M, K = x2d.shape
    N = w_bf16.shape[1]
    tm = _choose_tile_m(M)
    return pl.pallas_call(
        _embed_kernel,
        out_shape=jax.ShapeDtypeStruct((M, N), jnp.bfloat16),   # bf16 residual
        grid=(pl.cdiv(M, tm),),
        in_specs=[pl.BlockSpec((tm, K), lambda i: (i, 0)),
                  _w_spec((K, N)), _w_spec((1, N))],
        out_specs=pl.BlockSpec((tm, N), lambda i: (i, 0)),
        compiler_params=pltpu.CompilerParams(
            dimension_semantics=("parallel",),
            vmem_limit_bytes=_VMEM_LIMIT),
    )(x2d, w_bf16, b.reshape(1, N))


def _encoder_layer_kernel(h_ref, mask_ref, g1_ref, be1_ref, wqkv_ref, bqkv_ref,
                          wo_ref, bo_ref, g2_ref, be2_ref, w1_ref, bf1_ref,
                          w2_ref, bf2_ref, o_ref, *, num_heads, eps, scale):
    h = h_ref[...].astype(jnp.float32)                     # (S, D) residual
    S, D = h.shape
    dh = D // num_heads

    # ---- attention sublayer -------------------------------------------------
    hn = _layernorm_f32(h, g1_ref[...], be1_ref[...], eps)

    # Fused QKV projection: single lane-dense MXU pass, bf16 weights, f32 acc.
    qkv = jnp.dot(hn.astype(jnp.bfloat16), wqkv_ref[...],
                  preferred_element_type=jnp.float32) + bqkv_ref[...]  # (S,3D)

    # Key-mask bias, broadcast over heads & query rows (no (H,S,S) mask).
    bias = jnp.where(mask_ref[...] != 0.0,
                     jnp.float32(0.0), jnp.float32(_MASK_NEG))         # (1, S)

    # Per-head attention on lane-contiguous column slices (no (S,H,dh) reshape
    # and no 3-D einsum relayouts).
    heads = []
    for hi in range(num_heads):
        q_h = qkv[:, hi * dh:(hi + 1) * dh]
        k_h = qkv[:, D + hi * dh:D + (hi + 1) * dh]
        v_h = qkv[:, 2 * D + hi * dh:2 * D + (hi + 1) * dh]
        s = jax.lax.dot_general(
            q_h.astype(jnp.bfloat16), k_h.astype(jnp.bfloat16),
            (((1,), (1,)), ((), ())),
            preferred_element_type=jnp.float32) * scale                # (S, S)
        s = s + bias
        s = s - jnp.max(s, axis=-1, keepdims=True)
        p = jnp.exp(s)
        p = p * pl.reciprocal(jnp.sum(p, axis=-1, keepdims=True), approx=True)
        heads.append(jnp.dot(p.astype(jnp.bfloat16), v_h.astype(jnp.bfloat16),
                             preferred_element_type=jnp.float32))      # (S, dh)
    a = jnp.concatenate(heads, axis=-1)                                # (S, D)

    attn = jnp.dot(a.astype(jnp.bfloat16), wo_ref[...],
                   preferred_element_type=jnp.float32) + bo_ref[...]
    h2 = h + attn                                          # fused residual add

    # ---- FFN sublayer -------------------------------------------------------
    hn2 = _layernorm_f32(h2, g2_ref[...], be2_ref[...], eps)
    f = jnp.dot(hn2.astype(jnp.bfloat16), w1_ref[...],
                preferred_element_type=jnp.float32) + bf1_ref[...]
    f = jnp.maximum(f, 0.0)                                # ReLU in f32
    y = jnp.dot(f.astype(jnp.bfloat16), w2_ref[...],
                preferred_element_type=jnp.float32) + bf2_ref[...]

    o_ref[...] = (h2 + y).astype(o_ref.dtype)              # bf16 residual out


def encoder_layer(h, mask3, lp, num_heads):
    B, S, D = h.shape
    F = lp["w1"].shape[1]
    scale = 1.0 / math.sqrt(D // num_heads)
    kern = functools.partial(_encoder_layer_kernel, num_heads=num_heads,
                             eps=_LN_EPS, scale=scale)
    return pl.pallas_call(
        kern,
        out_shape=jax.ShapeDtypeStruct((B, S, D), jnp.bfloat16),
        grid=(B,),
        in_specs=[
            pl.BlockSpec((None, S, D), lambda b: (b, 0, 0)),   # h (bf16 residual)
            pl.BlockSpec((None, 1, S), lambda b: (b, 0, 0)),   # mask (B,1,S)
            _w_spec((1, D)), _w_spec((1, D)),                  # ln1 gamma/beta
            _w_spec((D, 3 * D)), _w_spec((1, 3 * D)),          # wqkv / bqkv
            _w_spec((D, D)), _w_spec((1, D)),                  # wo / bo
            _w_spec((1, D)), _w_spec((1, D)),                  # ln2 gamma/beta
            _w_spec((D, F)), _w_spec((1, F)),                  # w1 / b1
            _w_spec((F, D)), _w_spec((1, D)),                  # w2 / b2
        ],
        out_specs=pl.BlockSpec((None, S, D), lambda b: (b, 0, 0)),
        compiler_params=pltpu.CompilerParams(
            dimension_semantics=("parallel",),
            vmem_limit_bytes=_VMEM_LIMIT),
    )(h, mask3,
      lp["ln1_g"].reshape(1, D), lp["ln1_b"].reshape(1, D),
      lp["wqkv"], lp["bqkv"].reshape(1, 3 * D),
      lp["wo"], lp["bo"].reshape(1, D),
      lp["ln2_g"].reshape(1, D), lp["ln2_b"].reshape(1, D),
      lp["w1"], lp["b1"].reshape(1, F),
      lp["w2"], lp["b2"].reshape(1, D))


def _final_kernel(h_ref, g_ref, b_ref, w_ref, wb_ref, o_ref, *, eps):
    h = h_ref[...].astype(jnp.float32)
    hn = _layernorm_f32(h, g_ref[...], b_ref[...], eps)
    y = jnp.dot(hn.astype(jnp.bfloat16), w_ref[...],
                preferred_element_type=jnp.float32)
    o_ref[...] = (y + wb_ref[...]).astype(o_ref.dtype)


def final_norm_project(h2d, g, b, out_w_bf16, out_b):
    M, D = h2d.shape
    N = out_w_bf16.shape[1]
    # Lane-dense output: pad the projection to a multiple of 128 lanes and
    # slice in the wrapper (avoids masked vst.msk partial stores on a 4-wide
    # output slab).
    Npad = 128 * pl.cdiv(N, 128)
    w_pad = jnp.zeros((D, Npad), jnp.bfloat16).at[:, :N].set(out_w_bf16)
    b_pad = jnp.zeros((1, Npad), jnp.float32).at[0, :N].set(out_b)
    tm = _choose_tile_m(M)
    y = pl.pallas_call(
        functools.partial(_final_kernel, eps=_LN_EPS),
        out_shape=jax.ShapeDtypeStruct((M, Npad), jnp.float32),
        grid=(pl.cdiv(M, tm),),
        in_specs=[pl.BlockSpec((tm, D), lambda i: (i, 0)),
                  _w_spec((1, D)), _w_spec((1, D)),
                  _w_spec((D, Npad)), _w_spec((1, Npad))],
        out_specs=pl.BlockSpec((tm, Npad), lambda i: (i, 0)),
        compiler_params=pltpu.CompilerParams(
            dimension_semantics=("parallel",),
            vmem_limit_bytes=_VMEM_LIMIT),
    )(h2d, g.reshape(1, D), b.reshape(1, D), w_pad, b_pad)
    return y[:, :N]


# ----------------------------- model glue -----------------------------

def transformer_seg_v2_forward(params, x, mask, num_heads):
    B, S, Fin = x.shape
    D = params["emb_w"].shape[1]

    # lin_emb applied per position == one matmul over the flattened tokens.
    h = embed(x.reshape(B * S, Fin), params["emb_w"], params["emb_b"])
    h = h.reshape(B, S, D)                       # bf16 residual stream

    # (B, S) key mask -> (B, 1, S); broadcast over heads/queries in-kernel.
    mask3 = mask.reshape(B, 1, S).astype(jnp.float32)

    for lp in params["layers"]:
        h = encoder_layer(h, mask3, lp, num_heads)

    y = final_norm_project(h.reshape(B * S, D), params["ln_g"], params["ln_b"],
                           params["out_w"], params["out_b"])
    return y.reshape(B, S, -1)


def init_params(key, d_model, d_ff, num_heads, num_layers, in_features,
                out_features):
    def lin_init(k, fan_in, fan_out):
        kw, kb = jax.random.split(k)
        bound = 1.0 / math.sqrt(fan_in)
        w = jax.random.uniform(kw, (fan_in, fan_out), jnp.float32, -bound, bound)
        b = jax.random.uniform(kb, (fan_out,), jnp.float32, -bound, bound)
        return w, b

    keys = jax.random.split(key, num_layers + 2)
    params = {}
    params["emb_w"], params["emb_b"] = lin_init(keys[0], in_features, d_model)
    params["out_w"], params["out_b"] = lin_init(keys[1], d_model, out_features)
    params["ln_g"] = jnp.ones((d_model,), jnp.float32)
    params["ln_b"] = jnp.zeros((d_model,), jnp.float32)

    layers = []
    for li in range(num_layers):
        ks = jax.random.split(keys[2 + li], 6)
        lp = {}
        wq, bq = lin_init(ks[0], d_model, d_model)
        wk, bk = lin_init(ks[1], d_model, d_model)
        wv, bv = lin_init(ks[2], d_model, d_model)
        lp["wqkv"] = jnp.concatenate([wq, wk, wv], axis=1)     # (D, 3D) fused
        lp["bqkv"] = jnp.concatenate([bq, bk, bv], axis=0)     # (3D,)
        lp["wo"], lp["bo"] = lin_init(ks[3], d_model, d_model)
        lp["w1"], lp["b1"] = lin_init(ks[4], d_model, d_ff)
        lp["w2"], lp["b2"] = lin_init(ks[5], d_ff, d_model)
        lp["ln1_g"] = jnp.ones((d_model,), jnp.float32)
        lp["ln1_b"] = jnp.zeros((d_model,), jnp.float32)
        lp["ln2_g"] = jnp.ones((d_model,), jnp.float32)
        lp["ln2_b"] = jnp.zeros((d_model,), jnp.float32)
        layers.append(lp)
    params["layers"] = layers
    return params


def cast_params_for_tpu(params):
    """Cast matmul weights to bf16 once, wrapper-side (LN params / biases f32)."""
    p = dict(params)
    p["emb_w"] = params["emb_w"].astype(jnp.bfloat16)
    p["out_w"] = params["out_w"].astype(jnp.bfloat16)
    layers = []
    for lp in params["layers"]:
        lp = dict(lp)
        for k in ("wqkv", "wo", "w1", "w2"):
            lp[k] = lp[k].astype(jnp.bfloat16)
        layers.append(lp)
    p["layers"] = layers
    return p


if __name__ == "__main__":
    d_model, d_ff, num_heads, num_layers = 32, 64, 4, 2
    in_features, out_features = 16, 4
    B, S = 2, 8

    root = jax.random.PRNGKey(0)
    kparams, kx = jax.random.split(root)

    params = init_params(kparams, d_model, d_ff, num_heads, num_layers,
                         in_features, out_features)
    params = cast_params_for_tpu(params)   # bf16 weights, once, wrapper-side

    x = jax.random.normal(kx, (B, S, in_features), jnp.float32)
    mask = jnp.ones((B, S), jnp.float32).at[1, -2:].set(0.0)  # mask last 2 keys of batch 1

    fwd = jax.jit(functools.partial(transformer_seg_v2_forward,
                                    num_heads=num_heads))
    y = fwd(params, x, mask)
    y = jax.block_until_ready(y)

    assert y.shape == (B, S, out_features)
    assert bool(jnp.all(jnp.isfinite(y)))
    print("KERNEL_OK")
</pallas_src>

<mosaic_0001>
module attributes {stable_mosaic.version = 11 : i64} {
  func.func @_embed_kernel(%arg0: i32, %arg1: memref<16x16xf32, #tpu.memory_space<vmem>>, %arg2: memref<16x32xbf16, #tpu.memory_space<vmem>>, %arg3: memref<1x32xf32, #tpu.memory_space<vmem>>, %arg4: memref<16x32xbf16, #tpu.memory_space<vmem>>) attributes {dimension_semantics = [#tpu.dimension_semantics<parallel>], iteration_bounds = array<i64: 1>, scalar_prefetch = 0 : i64, scratch_operands = 0 : i64, tpu.core_type = #tpu.core_type<tc>, window_params = [{transform_indices = @transform_0, window_bounds = array<i64: 16, 16>}, {pipeline_mode = #tpu.pipeline_mode<synchronous>, transform_indices = @transform_1, window_bounds = array<i64: 16, 32>}, {pipeline_mode = #tpu.pipeline_mode<synchronous>, transform_indices = @transform_2, window_bounds = array<i64: 1, 32>}, {transform_indices = @transform_3, window_bounds = array<i64: 16, 32>}]} {
    %c0 = arith.constant 0 : index
    %c0_0 = arith.constant 0 : index
    %0 = vector.load %arg1[%c0, %c0_0] : memref<16x16xf32, #tpu.memory_space<vmem>>, vector<16x16xf32>
    %1 = arith.truncf %0 : vector<16x16xf32> to vector<16x16xbf16>
    %c0_1 = arith.constant 0 : index
    %c0_2 = arith.constant 0 : index
    %2 = vector.load %arg2[%c0_1, %c0_2] : memref<16x32xbf16, #tpu.memory_space<vmem>>, vector<16x32xbf16>
    %cst = arith.constant dense<0.000000e+00> : vector<16x32xf32>
    %3 = tpu.matmul %1, %2, %cst {dimension_numbers = #tpu.dot_dimension_numbers<[1], [0], [0], [1], [0, 0, 1, 1], [], []>} : vector<16x16xbf16>, vector<16x32xbf16>, vector<16x32xf32> -> vector<16x32xf32>
    %c0_3 = arith.constant 0 : index
    %c0_4 = arith.constant 0 : index
    %4 = vector.load %arg3[%c0_3, %c0_4] : memref<1x32xf32, #tpu.memory_space<vmem>>, vector<1x32xf32>
    %5 = vector.broadcast %4 : vector<1x32xf32> to vector<16x32xf32>
    %6 = arith.addf %3, %5 : vector<16x32xf32>
    %7 = arith.truncf %6 : vector<16x32xf32> to vector<16x32xbf16>
    %c0_5 = arith.constant 0 : index
    %c0_6 = arith.constant 0 : index
    %8 = vector.load %arg4[%c0_5, %c0_6] : memref<16x32xbf16, #tpu.memory_space<vmem>>, vector<16x32xbf16>
    tpu.vector_store %arg4[%c0_5, %c0_6], %7 {strides = array<i32>} : memref<16x32xbf16, #tpu.memory_space<vmem>>, vector<16x32xbf16>,
    return
  }
  func.func @transform_0(%arg0: i32) -> (i32, i32) {
    %c0_i32 = arith.constant 0 : i32
    %c0_i32_0 = arith.constant 0 : i32
    return %arg0, %c0_i32 : i32, i32
  }
  func.func @transform_1(%arg0: i32) -> (i32, i32) {
    %c0_i32 = arith.constant 0 : i32
    %c0_i32_0 = arith.constant 0 : i32
    %c0_i32_1 = arith.constant 0 : i32
    return %c0_i32, %c0_i32_0 : i32, i32
  }
  func.func @transform_2(%arg0: i32) -> (i32, i32) {
    %c0_i32 = arith.constant 0 : i32
    %c0_i32_0 = arith.constant 0 : i32
    %c0_i32_1 = arith.constant 0 : i32
    return %c0_i32, %c0_i32_0 : i32, i32
  }
  func.func @transform_3(%arg0: i32) -> (i32, i32) {
    %c0_i32 = arith.constant 0 : i32
    %c0_i32_0 = arith.constant 0 : i32
    return %arg0, %c0_i32 : i32, i32
  }
}

module attributes {stable_mosaic.version = 11 : i64} {
  func.func @_encoder_layer_kernel(%arg0: i32, %arg1: memref<1x8x32xbf16, #tpu.memory_space<vmem>>, %arg2: memref<1x1x8xf32, #tpu.memory_space<vmem>>, %arg3: memref<1x32xf32, #tpu.memory_space<vmem>>, %arg4: memref<1x32xf32, #tpu.memory_space<vmem>>, %arg5: memref<32x96xbf16, #tpu.memory_space<vmem>>, %arg6: memref<1x96xf32, #tpu.memory_space<vmem>>, %arg7: memref<32x32xbf16, #tpu.memory_space<vmem>>, %arg8: memref<1x32xf32, #tpu.memory_space<vmem>>, %arg9: memref<1x32xf32, #tpu.memory_space<vmem>>, %arg10: memref<1x32xf32, #tpu.memory_space<vmem>>, %arg11: memref<32x64xbf16, #tpu.memory_space<vmem>>, %arg12: memref<1x64xf32, #tpu.memory_space<vmem>>, %arg13: memref<64x32xbf16, #tpu.memory_space<vmem>>, %arg14: memref<1x32xf32, #tpu.memory_space<vmem>>, %arg15: memref<1x8x32xbf16, #tpu.memory_space<vmem>>) attributes {dimension_semantics = [#tpu.dimension_semantics<parallel>], iteration_bounds = array<i64: 2>, scalar_prefetch = 0 : i64, scratch_operands = 0 : i64, tpu.core_type = #tpu.core_type<tc>, window_params = [{transform_indices = @transform_0, window_bounds = array<i64: 1, 8, 32>}, {transform_indices = @transform_1, window_bounds = array<i64: 1, 1, 8>}, {pipeline_mode = #tpu.pipeline_mode<synchronous>, transform_indices = @transform_2, window_bounds = array<i64: 1, 32>}, {pipeline_mode = #tpu.pipeline_mode<synchronous>, transform_indices = @transform_3, window_bounds = array<i64: 1, 32>}, {pipeline_mode = #tpu.pipeline_mode<synchronous>, transform_indices = @transform_4, window_bounds = array<i64: 32, 96>}, {pipeline_mode = #tpu.pipeline_mode<synchronous>, transform_indices = @transform_5, window_bounds = array<i64: 1, 96>}, {pipeline_mode = #tpu.pipeline_mode<synchronous>, transform_indices = @transform_6, window_bounds = array<i64: 32, 32>}, {pipeline_mode = #tpu.pipeline_mode<synchronous>, transform_indices = @transform_7, window_bounds = array<i64: 1, 32>}, {pipeline_mode = #tpu.pipeline_mode<synchronous>, transform_indices = @transform_8, window_bounds = array<i64: 1, 32>}, {pipeline_mode = #tpu.pipeline_mode<synchronous>, transform_indices = @transform_9, window_bounds = array<i64: 1, 32>}, {pipeline_mode = #tpu.pipeline_mode<synchronous>, transform_indices = @transform_10, window_bounds = array<i64: 32, 64>}, {pipeline_mode = #tpu.pipeline_mode<synchronous>, transform_indices = @transform_11, window_bounds = array<i64: 1, 64>}, {pipeline_mode = #tpu.pipeline_mode<synchronous>, transform_indices = @transform_12, window_bounds = array<i64: 64, 32>}, {pipeline_mode = #tpu.pipeline_mode<synchronous>, transform_indices = @transform_13, window_bounds = array<i64: 1, 32>}, {transform_indices = @transform_14, window_bounds = array<i64: 1, 8, 32>}]} {
    %c0 = arith.constant 0 : index
    %c0_0 = arith.constant 0 : index
    %c0_1 = arith.constant 0 : index
    %0 = vector.load %arg1[%c0, %c0_0, %c0_1] : memref<1x8x32xbf16, #tpu.memory_space<vmem>>, vector<1x8x32xbf16>
    %1 = vector.shape_cast %0 : vector<1x8x32xbf16> to vector<8x32xbf16>
    %2 = arith.extf %1 : vector<8x32xbf16> to vector<8x32xf32>
    %c0_2 = arith.constant 0 : index
    %c0_3 = arith.constant 0 : index
    %3 = vector.load %arg3[%c0_2, %c0_3] : memref<1x32xf32, #tpu.memory_space<vmem>>, vector<1x32xf32>
    %c0_4 = arith.constant 0 : index
    %c0_5 = arith.constant 0 : index
    %4 = vector.load %arg4[%c0_4, %c0_5] : memref<1x32xf32, #tpu.memory_space<vmem>>, vector<1x32xf32>
    %cst = arith.constant dense<0.000000e+00> : vector<8xf32>
    %5 = vector.multi_reduction <add>, %2, %cst [1] : vector<8x32xf32> to vector<8xf32>
    %6 = vector.shape_cast %5 : vector<8xf32> to vector<8x1xf32>
    %cst_6 = arith.constant 3.200000e+01 : f32
    %7 = vector.broadcast %cst_6 : f32 to vector<8x1xf32>
    %8 = arith.divf %6, %7 : vector<8x1xf32>
    %9 = vector.broadcast %8 : vector<8x1xf32> to vector<8x32xf32>
    %10 = arith.subf %2, %9 : vector<8x32xf32>
    %11 = arith.mulf %10, %10 : vector<8x32xf32>
    %cst_7 = arith.constant dense<0.000000e+00> : vector<8xf32>
    %12 = vector.multi_reduction <add>, %11, %cst_7 [1] : vector<8x32xf32> to vector<8xf32>
    %13 = vector.shape_cast %12 : vector<8xf32> to vector<8x1xf32>
    %cst_8 = arith.constant 3.100000e+01 : f32
    %14 = vector.broadcast %cst_8 : f32 to vector<8x1xf32>
    %15 = arith.divf %13, %14 : vector<8x1xf32>
    %16 = vector.broadcast %8 : vector<8x1xf32> to vector<8x32xf32>
    %17 = arith.subf %2, %16 : vector<8x32xf32>
    %18 = vector.broadcast %3 : vector<1x32xf32> to vector<8x32xf32>
    %19 = arith.mulf %18, %17 : vector<8x32xf32>
    %20 = math.sqrt %15 : vector<8x1xf32>
    %cst_9 = arith.constant 9.99999997E-7 : f32
    %21 = vector.broadcast %cst_9 : f32 to vector<8x1xf32>
    %22 = arith.addf %20, %21 : vector<8x1xf32>
    %23 = vector.broadcast %22 : vector<8x1xf32> to vector<8x32xf32>
    %24 = arith.divf %19, %23 : vector<8x32xf32>
    %25 = vector.broadcast %4 : vector<1x32xf32> to vector<8x32xf32>
    %26 = arith.addf %24, %25 : vector<8x32xf32>
    %27 = arith.truncf %26 : vector<8x32xf32> to vector<8x32xbf16>
    %c0_10 = arith.constant 0 : index
    %c0_11 = arith.constant 0 : index
    %28 = vector.load %arg5[%c0_10, %c0_11] : memref<32x96xbf16, #tpu.memory_space<vmem>>, vector<32x96xbf16>
    %cst_12 = arith.constant dense<0.000000e+00> : vector<8x96xf32>
    %29 = tpu.matmul %27, %28, %cst_12 {dimension_numbers = #tpu.dot_dimension_numbers<[1], [0], [0], [1], [0, 0, 1, 1], [], []>} : vector<8x32xbf16>, vector<32x96xbf16>, vector<8x96xf32> -> vector<8x96xf32>
    %c0_13 = arith.constant 0 : index
    %c0_14 = arith.constant 0 : index
    %30 = vector.load %arg6[%c0_13, %c0_14] : memref<1x96xf32, #tpu.memory_space<vmem>>, vector<1x96xf32>
    %31 = vector.broadcast %30 : vector<1x96xf32> to vector<8x96xf32>
    %32 = arith.addf %29, %31 : vector<8x96xf32>
    %c0_15 = arith.constant 0 : index
    %c0_16 = arith.constant 0 : index
    %c0_17 = arith.constant 0 : index
    %33 = vector.load %arg2[%c0_15, %c0_16, %c0_17] : memref<1x1x8xf32, #tpu.memory_space<vmem>>, vector<1x1x8xf32>
    %34 = vector.shape_cast %33 : vector<1x1x8xf32> to vector<1x8xf32>
    %cst_18 = arith.constant 0.000000e+00 : f32
    %35 = vector.broadcast %cst_18 : f32 to vector<1x8xf32>
    %36 = arith.cmpf one, %34, %35 : vector<1x8xf32>
    %cst_19 = arith.constant 0.000000e+00 : f32
    %cst_20 = arith.constant -1.000000e+09 : f32
    %37 = vector.broadcast %cst_19 : f32 to vector<1x8xf32>
    %38 = vector.broadcast %cst_20 : f32 to vector<1x8xf32>
    %39 = arith.select %36, %37, %38 : vector<1x8xi1>, vector<1x8xf32>
    %40 = vector.extract_strided_slice %32 {offsets = [0, 0], sizes = [8, 8], strides = [1, 1]} : vector<8x96xf32> to vector<8x8xf32>
    %41 = vector.extract_strided_slice %32 {offsets = [0, 32], sizes = [8, 8], strides = [1, 1]} : vector<8x96xf32> to vector<8x8xf32>
    %42 = vector.extract_strided_slice %32 {offsets = [0, 64], sizes = [8, 8], strides = [1, 1]} : vector<8x96xf32> to vector<8x8xf32>
    %43 = arith.truncf %40 : vector<8x8xf32> to vector<8x8xbf16>
    %44 = arith.truncf %41 : vector<8x8xf32> to vector<8x8xbf16>
    %cst_21 = arith.constant dense<0.000000e+00> : vector<8x8xf32>
    %45 = tpu.matmul %43, %44, %cst_21 {dimension_numbers = #tpu.dot_dimension_numbers<[1], [1], [0], [0], [0, 0, 1, 0], [], []>} : vector<8x8xbf16>, vector<8x8xbf16>, vector<8x8xf32> -> vector<8x8xf32>
    %cst_22 = arith.constant 0.353553385 : f32
    %46 = vector.broadcast %cst_22 : f32 to vector<8x8xf32>
    %47 = arith.mulf %45, %46 : vector<8x8xf32>
    %48 = vector.broadcast %39 : vector<1x8xf32> to vector<8x8xf32>
    %49 = arith.addf %47, %48 : vector<8x8xf32>
    %cst_23 = arith.constant dense<0xFF800000> : vector<8xf32>
    %50 = vector.multi_reduction <maximumf>, %49, %cst_23 [1] : vector<8x8xf32> to vector<8xf32>
    %51 = vector.shape_cast %50 : vector<8xf32> to vector<8x1xf32>
    %52 = vector.broadcast %51 : vector<8x1xf32> to vector<8x8xf32>
    %53 = arith.subf %49, %52 : vector<8x8xf32>
    %54 = math.exp %53 : vector<8x8xf32>
    %cst_24 = arith.constant dense<0.000000e+00> : vector<8xf32>
    %55 = vector.multi_reduction <add>, %54, %cst_24 [1] : vector<8x8xf32> to vector<8xf32>
    %56 = vector.shape_cast %55 : vector<8xf32> to vector<8x1xf32>
    %57 = tpu.reciprocal %56 {approx = true} : vector<8x1xf32> -> vector<8x1xf32>
    %58 = vector.broadcast %57 : vector<8x1xf32> to vector<8x8xf32>
    %59 = arith.mulf %54, %58 : vector<8x8xf32>
    %60 = arith.truncf %59 : vector<8x8xf32> to vector<8x8xbf16>
    %61 = arith.truncf %42 : vector<8x8xf32> to vector<8x8xbf16>
    %cst_25 = arith.constant dense<0.000000e+00> : vector<8x8xf32>
    %62 = tpu.matmul %60, %61, %cst_25 {dimension_numbers = #tpu.dot_dimension_numbers<[1], [0], [0], [1], [0, 0, 1, 1], [], []>} : vector<8x8xbf16>, vector<8x8xbf16>, vector<8x8xf32> -> vector<8x8xf32>
    %63 = vector.extract_strided_slice %32 {offsets = [0, 8], sizes = [8, 8], strides = [1, 1]} : vector<8x96xf32> to vector<8x8xf32>
    %64 = vector.extract_strided_slice %32 {offsets = [0, 40], sizes = [8, 8], strides = [1, 1]} : vector<8x96xf32> to vector<8x8xf32>
    %65 = vector.extract_strided_slice %32 {offsets = [0, 72], sizes = [8, 8], strides = [1, 1]} : vector<8x96xf32> to vector<8x8xf32>
    %66 = arith.truncf %63 : vector<8x8xf32> to vector<8x8xbf16>
    %67 = arith.truncf %64 : vector<8x8xf32> to vector<8x8xbf16>
    %cst_26 = arith.constant dense<0.000000e+00> : vector<8x8xf32>
    %68 = tpu.matmul %66, %67, %cst_26 {dimension_numbers = #tpu.dot_dimension_numbers<[1], [1], [0], [0], [0, 0, 1, 0], [], []>} : vector<8x8xbf16>, vector<8x8xbf16>, vector<8x8xf32> -> vector<8x8xf32>
    %cst_27 = arith.constant 0.353553385 : f32
    %69 = vector.broadcast %cst_27 : f32 to vector<8x8xf32>
    %70 = arith.mulf %68, %69 : vector<8x8xf32>
    %71 = vector.broadcast %39 : vector<1x8xf32> to vector<8x8xf32>
    %72 = arith.addf %70, %71 : vector<8x8xf32>
    %cst_28 = arith.constant dense<0xFF800000> : vector<8xf32>
    %73 = vector.multi_reduction <maximumf>, %72, %cst_28 [1] : vector<8x8xf32> to vector<8xf32>
    %74 = vector.shape_cast %73 : vector<8xf32> to vector<8x1xf32>
    %75 = vector.broadcast %74 : vector<8x1xf32> to vector<8x8xf32>
    %76 = arith.subf %72, %75 : vector<8x8xf32>
    %77 = math.exp %76 : vector<8x8xf32>
    %cst_29 = arith.constant dense<0.000000e+00> : vector<8xf32>
    %78 = vector.multi_reduction <add>, %77, %cst_29 [1] : vector<8x8xf32> to vector<8xf32>
    %79 = vector.shape_cast %78 : vector<8xf32> to vector<8x1xf32>
    %80 = tpu.reciprocal %79 {approx = true} : vector<8x1xf32> -> vector<8x1xf32>
    %81 = vector.broadcast %80 : vector<8x1xf32> to vector<8x8xf32>
    %82 = arith.mulf %77, %81 : vector<8x8xf32>
    %83 = arith.truncf %82 : vector<8x8xf32> to vector<8x8xbf16>
    %84 = arith.truncf %65 : vector<8x8xf32> to vector<8x8xbf16>
    %cst_30 = arith.constant dense<0.000000e+00> : vector<8x8xf32>
    %85 = tpu.matmul %83, %84, %cst_30 {dimension_numbers = #tpu.dot_dimension_numbers<[1], [0], [0], [1], [0, 0, 1, 1], [], []>} : vector<8x8xbf16>, vector<8x8xbf16>, vector<8x8xf32> -> vector<8x8xf32>
    %86 = vector.extract_strided_slice %32 {offsets = [0, 16], sizes = [8, 8], strides = [1, 1]} : vector<8x96xf32> to vector<8x8xf32>
    %87 = vector.extract_strided_slice %32 {offsets = [0, 48], sizes = [8, 8], strides = [1, 1]} : vector<8x96xf32> to vector<8x8xf32>
    %88 = vector.extract_strided_slice %32 {offsets = [0, 80], sizes = [8, 8], strides = [1, 1]} : vector<8x96xf32> to vector<8x8xf32>
    %89 = arith.truncf %86 : vector<8x8xf32> to vector<8x8xbf16>
    %90 = arith.truncf %87 : vector<8x8xf32> to vector<8x8xbf16>
    %cst_31 = arith.constant dense<0.000000e+00> : vector<8x8xf32>
    %91 = tpu.matmul %89, %90, %cst_31 {dimension_numbers = #tpu.dot_dimension_numbers<[1], [1], [0], [0], [0, 0, 1, 0], [], []>} : vector<8x8xbf16>, vector<8x8xbf16>, vector<8x8xf32> -> vector<8x8xf32>
    %cst_32 = arith.constant 0.353553385 : f32
    %92 = vector.broadcast %cst_32 : f32 to vector<8x8xf32>
    %93 = arith.mulf %91, %92 : vector<8x8xf32>
    %94 = vector.broadcast %39 : vector<1x8xf32> to vector<8x8xf32>
    %95 = arith.addf %93, %94 : vector<8x8xf32>
    %cst_33 = arith.constant dense<0xFF800000> : vector<8xf32>
    %96 = vector.multi_reduction <maximumf>, %95, %cst_33 [1] : vector<8x8xf32> to vector<8xf32>
    %97 = vector.shape_cast %96 : vector<8xf32> to vector<8x1xf32>
    %98 = vector.broadcast %97 : vector<8x1xf32> to vector<8x8xf32>
    %99 = arith.subf %95, %98 : vector<8x8xf32>
    %100 = math.exp %99 : vector<8x8xf32>
    %cst_34 = arith.constant dense<0.000000e+00> : vector<8xf32>
    %101 = vector.multi_reduction <add>, %100, %cst_34 [1] : vector<8x8xf32> to vector<8xf32>
    %102 = vector.shape_cast %101 : vector<8xf32> to vector<8x1xf32>
    %103 = tpu.reciprocal %102 {approx = true} : vector<8x1xf32> -> vector<8x1xf32>
    %104 = vector.broadcast %103 : vector<8x1xf32> to vector<8x8xf32>
    %105 = arith.mulf %100, %104 : vector<8x8xf32>
    %106 = arith.truncf %105 : vector<8x8xf32> to vector<8x8xbf16>
    %107 = arith.truncf %88 : vector<8x8xf32> to vector<8x8xbf16>
    %cst_35 = arith.constant dense<0.000000e+00> : vector<8x8xf32>
    %108 = tpu.matmul %106, %107, %cst_35 {dimension_numbers = #tpu.dot_dimension_numbers<[1], [0], [0], [1], [0, 0, 1, 1], [], []>} : vector<8x8xbf16>, vector<8x8xbf16>, vector<8x8xf32> -> vector<8x8xf32>
    %109 = vector.extract_strided_slice %32 {offsets = [0, 24], sizes = [8, 8], strides = [1, 1]} : vector<8x96xf32> to vector<8x8xf32>
    %110 = vector.extract_strided_slice %32 {offsets = [0, 56], sizes = [8, 8], strides = [1, 1]} : vector<8x96xf32> to vector<8x8xf32>
    %111 = vector.extract_strided_slice %32 {offsets = [0, 88], sizes = [8, 8], strides = [1, 1]} : vector<8x96xf32> to vector<8x8xf32>
    %112 = arith.truncf %109 : vector<8x8xf32> to vector<8x8xbf16>
    %113 = arith.truncf %110 : vector<8x8xf32> to vector<8x8xbf16>
    %cst_36 = arith.constant dense<0.000000e+00> : vector<8x8xf32>
    %114 = tpu.matmul %112, %113, %cst_36 {dimension_numbers = #tpu.dot_dimension_numbers<[1], [1], [0], [0], [0, 0, 1, 0], [], []>} : vector<8x8xbf16>, vector<8x8xbf16>, vector<8x8xf32> -> vector<8x8xf32>
    %cst_37 = arith.constant 0.353553385 : f32
    %115 = vector.broadcast %cst_37 : f32 to vector<8x8xf32>
    %116 = arith.mulf %114, %115 : vector<8x8xf32>
    %117 = vector.broadcast %39 : vector<1x8xf32> to vector<8x8xf32>
    %118 = arith.addf %116, %117 : vector<8x8xf32>
    %cst_38 = arith.constant dense<0xFF800000> : vector<8xf32>
    %119 = vector.multi_reduction <maximumf>, %118, %cst_38 [1] : vector<8x8xf32> to vector<8xf32>
    %120 = vector.shape_cast %119 : vector<8xf32> to vector<8x1xf32>
    %121 = vector.broadcast %120 : vector<8x1xf32> to vector<8x8xf32>
    %122 = arith.subf %118, %121 : vector<8x8xf32>
    %123 = math.exp %122 : vector<8x8xf32>
    %cst_39 = arith.constant dense<0.000000e+00> : vector<8xf32>
    %124 = vector.multi_reduction <add>, %123, %cst_39 [1] : vector<8x8xf32> to vector<8xf32>
    %125 = vector.shape_cast %124 : vector<8xf32> to vector<8x1xf32>
    %126 = tpu.reciprocal %125 {approx = true} : vector<8x1xf32> -> vector<8x1xf32>
    %127 = vector.broadcast %126 : vector<8x1xf32> to vector<8x8xf32>
    %128 = arith.mulf %123, %127 : vector<8x8xf32>
    %129 = arith.truncf %128 : vector<8x8xf32> to vector<8x8xbf16>
    %130 = arith.truncf %111 : vector<8x8xf32> to vector<8x8xbf16>
    %cst_40 = arith.constant dense<0.000000e+00> : vector<8x8xf32>
    %131 = tpu.matmul %129, %130, %cst_40 {dimension_numbers = #tpu.dot_dimension_numbers<[1], [0], [0], [1], [0, 0, 1, 1], [], []>} : vector<8x8xbf16>, vector<8x8xbf16>, vector<8x8xf32> -> vector<8x8xf32>
    %132 = tpu.concatenate %62, %85, %108, %131 in 1 : vector<8x8xf32>, vector<8x8xf32>, vector<8x8xf32>, vector<8x8xf32> -> vector<8x32xf32>
    %133 = arith.truncf %132 : vector<8x32xf32> to vector<8x32xbf16>
    %c0_41 = arith.constant 0 : index
    %c0_42 = arith.constant 0 : index
    %134 = vector.load %arg7[%c0_41, %c0_42] : memref<32x32xbf16, #tpu.memory_space<vmem>>, vector<32x32xbf16>
    %cst_43 = arith.constant dense<0.000000e+00> : vector<8x32xf32>
    %135 = tpu.matmul %133, %134, %cst_43 {dimension_numbers = #tpu.dot_dimension_numbers<[1], [0], [0], [1], [0, 0, 1, 1], [], []>} : vector<8x32xbf16>, vector<32x32xbf16>, vector<8x32xf32> -> vector<8x32xf32>
    %c0_44 = arith.constant 0 : index
    %c0_45 = arith.constant 0 : index
    %136 = vector.load %arg8[%c0_44, %c0_45] : memref<1x32xf32, #tpu.memory_space<vmem>>, vector<1x32xf32>
    %137 = vector.broadcast %136 : vector<1x32xf32> to vector<8x32xf32>
    %138 = arith.addf %135, %137 : vector<8x32xf32>
    %139 = arith.addf %2, %138 : vector<8x32xf32>
    %c0_46 = arith.constant 0 : index
    %c0_47 = arith.constant 0 : index
    %140 = vector.load %arg9[%c0_46, %c0_47] : memref<1x32xf32, #tpu.memory_space<vmem>>, vector<1x32xf32>
    %c0_48 = arith.constant 0 : index
    %c0_49 = arith.constant 0 : index
    %141 = vector.load %arg10[%c0_48, %c0_49] : memref<1x32xf32, #tpu.memory_space<vmem>>, vector<1x32xf32>
    %cst_50 = arith.constant dense<0.000000e+00> : vector<8xf32>
    %142 = vector.multi_reduction <add>, %139, %cst_50 [1] : vector<8x32xf32> to vector<8xf32>
    %143 = vector.shape_cast %142 : vector<8xf32> to vector<8x1xf32>
    %cst_51 = arith.constant 3.200000e+01 : f32
    %144 = vector.broadcast %cst_51 : f32 to vector<8x1xf32>
    %145 = arith.divf %143, %144 : vector<8x1xf32>
    %146 = vector.broadcast %145 : vector<8x1xf32> to vector<8x32xf32>
    %147 = arith.subf %139, %146 : vector<8x32xf32>
    %148 = arith.mulf %147, %147 : vector<8x32xf32>
    %cst_52 = arith.constant dense<0.000000e+00> : vector<8xf32>
    %149 = vector.multi_reduction <add>, %148, %cst_52 [1] : vector<8x32xf32> to vector<8xf32>
    %150 = vector.shape_cast %149 : vector<8xf32> to vector<8x1xf32>
    %cst_53 = arith.constant 3.100000e+01 : f32
    %151 = vector.broadcast %cst_53 : f32 to vector<8x1xf32>
    %152 = arith.divf %150, %151 : vector<8x1xf32>
    %153 = vector.broadcast %145 : vector<8x1xf32> to vector<8x32xf32>
    %154 = arith.subf %139, %153 : vector<8x32xf32>
    %155 = vector.broadcast %140 : vector<1x32xf32> to vector<8x32xf32>
    %156 = arith.mulf %155, %154 : vector<8x32xf32>
    %157 = math.sqrt %152 : vector<8x1xf32>
    %cst_54 = arith.constant 9.99999997E-7 : f32
    %158 = vector.broadcast %cst_54 : f32 to vector<8x1xf32>
    %159 = arith.addf %157, %158 : vector<8x1xf32>
    %160 = vector.broadcast %159 : vector<8x1xf32> to vector<8x32xf32>
    %161 = arith.divf %156, %160 : vector<8x32xf32>
    %162 = vector.broadcast %141 : vector<1x32xf32> to vector<8x32xf32>
    %163 = arith.addf %161, %162 : vector<8x32xf32>
    %164 = arith.truncf %163 : vector<8x32xf32> to vector<8x32xbf16>
    %c0_55 = arith.constant 0 : index
    %c0_56 = arith.constant 0 : index
    %165 = vector.load %arg11[%c0_55, %c0_56] : memref<32x64xbf16, #tpu.memory_space<vmem>>, vector<32x64xbf16>
    %cst_57 = arith.constant dense<0.000000e+00> : vector<8x64xf32>
    %166 = tpu.matmul %164, %165, %cst_57 {dimension_numbers = #tpu.dot_dimension_numbers<[1], [0], [0], [1], [0, 0, 1, 1], [], []>} : vector<8x32xbf16>, vector<32x64xbf16>, vector<8x64xf32> -> vector<8x64xf32>
    %c0_58 = arith.constant 0 : index
    %c0_59 = arith.constant 0 : index
    %167 = vector.load %arg12[%c0_58, %c0_59] : memref<1x64xf32, #tpu.memory_space<vmem>>, vector<1x64xf32>
    %168 = vector.broadcast %167 : vector<1x64xf32> to vector<8x64xf32>
    %169 = arith.addf %166, %168 : vector<8x64xf32>
    %cst_60 = arith.constant 0.000000e+00 : f32
    %170 = vector.broadcast %cst_60 : f32 to vector<8x64xf32>
    %171 = arith.maximumf %169, %170 : vector<8x64xf32>
    %172 = arith.truncf %171 : vector<8x64xf32> to vector<8x64xbf16>
    %c0_61 = arith.constant 0 : index
    %c0_62 = arith.constant 0 : index
    %173 = vector.load %arg13[%c0_61, %c0_62] : memref<64x32xbf16, #tpu.memory_space<vmem>>, vector<64x32xbf16>
    %cst_63 = arith.constant dense<0.000000e+00> : vector<8x32xf32>
    %174 = tpu.matmul %172, %173, %cst_63 {dimension_numbers = #tpu.dot_dimension_numbers<[1], [0], [0], [1], [0, 0, 1, 1], [], []>} : vector<8x64xbf16>, vector<64x32xbf16>, vector<8x32xf32> -> vector<8x32xf32>
    %c0_64 = arith.constant 0 : index
    %c0_65 = arith.constant 0 : index
    %175 = vector.load %arg14[%c0_64, %c0_65] : memref<1x32xf32, #tpu.memory_space<vmem>>, vector<1x32xf32>
    %176 = vector.broadcast %175 : vector<1x32xf32> to vector<8x32xf32>
    %177 = arith.addf %174, %176 : vector<8x32xf32>
    %178 = arith.addf %139, %177 : vector<8x32xf32>
    %179 = arith.truncf %178 : vector<8x32xf32> to vector<8x32xbf16>
    %c0_66 = arith.constant 0 : index
    %c0_67 = arith.constant 0 : index
    %c0_68 = arith.constant 0 : index
    %180 = vector.load %arg15[%c0_66, %c0_67, %c0_68] : memref<1x8x32xbf16, #tpu.memory_space<vmem>>, vector<1x8x32xbf16>
    %181 = vector.shape_cast %180 : vector<1x8x32xbf16> to vector<8x32xbf16>
    %182 = vector.shape_cast %179 : vector<8x32xbf16> to vector<1x8x32xbf16>
    tpu.vector_store %arg15[%c0_66, %c0_67, %c0_68], %182 {strides = array<i32>} : memref<1x8x32xbf16, #tpu.memory_space<vmem>>, vector<1x8x32xbf16>,
    return
  }
  func.func @transform_0(%arg0: i32) -> (i32, i32, i32) {
    %c0_i32 = arith.constant 0 : i32
    %c0_i32_0 = arith.constant 0 : i32
    %c0_i32_1 = arith.constant 0 : i32
    return %arg0, %c0_i32, %c0_i32_0 : i32, i32, i32
  }
  func.func @transform_1(%arg0: i32) -> (i32, i32, i32) {
    %c0_i32 = arith.constant 0 : i32
    %c0_i32_0 = arith.constant 0 : i32
    %c0_i32_1 = arith.constant 0 : i32
    return %arg0, %c0_i32, %c0_i32_0 : i32, i32, i32
  }
  func.func @transform_2(%arg0: i32) -> (i32, i32) {
    %c0_i32 = arith.constant 0 : i32
    %c0_i32_0 = arith.constant 0 : i32
    %c0_i32_1 = arith.constant 0 : i32
    return %c0_i32, %c0_i32_0 : i32, i32
  }
  func.func @transform_3(%arg0: i32) -> (i32, i32) {
    %c0_i32 = arith.constant 0 : i32
    %c0_i32_0 = arith.constant 0 : i32
    %c0_i32_1 = arith.constant 0 : i32
    return %c0_i32, %c0_i32_0 : i32, i32
  }
  func.func @transform_4(%arg0: i32) -> (i32, i32) {
    %c0_i32 = arith.constant 0 : i32
    %c0_i32_0 = arith.constant 0 : i32
    %c0_i32_1 = arith.constant 0 : i32
    return %c0_i32, %c0_i32_0 : i32, i32
  }
  func.func @transform_5(%arg0: i32) -> (i32, i32) {
    %c0_i32 = arith.constant 0 : i32
    %c0_i32_0 = arith.constant 0 : i32
    %c0_i32_1 = arith.constant 0 : i32
    return %c0_i32, %c0_i32_0 : i32, i32
  }
  func.func @transform_6(%arg0: i32) -> (i32, i32) {
    %c0_i32 = arith.constant 0 : i32
    %c0_i32_0 = arith.constant 0 : i32
    %c0_i32_1 = arith.constant 0 : i32
    return %c0_i32, %c0_i32_0 : i32, i32
  }
  func.func @transform_7(%arg0: i32) -> (i32, i32) {
    %c0_i32 = arith.constant 0 : i32
    %c0_i32_0 = arith.constant 0 : i32
    %c0_i32_1 = arith.constant 0 : i32
    return %c0_i32, %c0_i32_0 : i32, i32
  }
  func.func @transform_8(%arg0: i32) -> (i32, i32) {
    %c0_i32 = arith.constant 0 : i32
    %c0_i32_0 = arith.constant 0 : i32
    %c0_i32_1 = arith.constant 0 : i32
    return %c0_i32, %c0_i32_0 : i32, i32
  }
  func.func @transform_9(%arg0: i32) -> (i32, i32) {
    %c0_i32 = arith.constant 0 : i32
    %c0_i32_0 = arith.constant 0 : i32
    %c0_i32_1 = arith.constant 0 : i32
    return %c0_i32, %c0_i32_0 : i32, i32
  }
  func.func @transform_10(%arg0: i32) -> (i32, i32) {
    %c0_i32 = arith.constant 0 : i32
    %c0_i32_0 = arith.constant 0 : i32
    %c0_i32_1 = arith.constant 0 : i32
    return %c0_i32, %c0_i32_0 : i32, i32
  }
  func.func @transform_11(%arg0: i32) -> (i32, i32) {
    %c0_i32 = arith.constant 0 : i32
    %c0_i32_0 = arith.constant 0 : i32
    %c0_i32_1 = arith.constant 0 : i32
    return %c0_i32, %c0_i32_0 : i32, i32
  }
  func.func @transform_12(%arg0: i32) -> (i32, i32) {
    %c0_i32 = arith.constant 0 : i32
    %c0_i32_0 = arith.constant 0 : i32
    %c0_i32_1 = arith.constant 0 : i32
    return %c0_i32, %c0_i32_0 : i32, i32
  }
  func.func @transform_13(%arg0: i32) -> (i32, i32) {
    %c0_i32 = arith.constant 0 : i32
    %c0_i32_0 = arith.constant 0 : i32
    %c0_i32_1 = arith.constant 0 : i32
    return %c0_i32, %c0_i32_0 : i32, i32
  }
  func.func @transform_14(%arg0: i32) -> (i32, i32, i32) {
    %c0_i32 = arith.constant 0 : i32
    %c0_i32_0 = arith.constant 0 : i32
    %c0_i32_1 = arith.constant 0 : i32
    return %arg0, %c0_i32, %c0_i32_0 : i32, i32, i32
  }
}

module attributes {stable_mosaic.version = 11 : i64} {
  func.func @_final_kernel(%arg0: i32, %arg1: memref<16x32xbf16, #tpu.memory_space<vmem>>, %arg2: memref<1x32xf32, #tpu.memory_space<vmem>>, %arg3: memref<1x32xf32, #tpu.memory_space<vmem>>, %arg4: memref<32x128xbf16, #tpu.memory_space<vmem>>, %arg5: memref<1x128xf32, #tpu.memory_space<vmem>>, %arg6: memref<16x128xf32, #tpu.memory_space<vmem>>) attributes {dimension_semantics = [#tpu.dimension_semantics<parallel>], iteration_bounds = array<i64: 1>, scalar_prefetch = 0 : i64, scratch_operands = 0 : i64, tpu.core_type = #tpu.core_type<tc>, window_params = [{transform_indices = @transform_0, window_bounds = array<i64: 16, 32>}, {pipeline_mode = #tpu.pipeline_mode<synchronous>, transform_indices = @transform_1, window_bounds = array<i64: 1, 32>}, {pipeline_mode = #tpu.pipeline_mode<synchronous>, transform_indices = @transform_2, window_bounds = array<i64: 1, 32>}, {pipeline_mode = #tpu.pipeline_mode<synchronous>, transform_indices = @transform_3, window_bounds = array<i64: 32, 128>}, {pipeline_mode = #tpu.pipeline_mode<synchronous>, transform_indices = @transform_4, window_bounds = array<i64: 1, 128>}, {transform_indices = @transform_5, window_bounds = array<i64: 16, 128>}]} {
    %c0 = arith.constant 0 : index
    %c0_0 = arith.constant 0 : index
    %0 = vector.load %arg1[%c0, %c0_0] : memref<16x32xbf16, #tpu.memory_space<vmem>>, vector<16x32xbf16>
    %1 = arith.extf %0 : vector<16x32xbf16> to vector<16x32xf32>
    %c0_1 = arith.constant 0 : index
    %c0_2 = arith.constant 0 : index
    %2 = vector.load %arg2[%c0_1, %c0_2] : memref<1x32xf32, #tpu.memory_space<vmem>>, vector<1x32xf32>
    %c0_3 = arith.constant 0 : index
    %c0_4 = arith.constant 0 : index
    %3 = vector.load %arg3[%c0_3, %c0_4] : memref<1x32xf32, #tpu.memory_space<vmem>>, vector<1x32xf32>
    %cst = arith.constant dense<0.000000e+00> : vector<16xf32>
    %4 = vector.multi_reduction <add>, %1, %cst [1] : vector<16x32xf32> to vector<16xf32>
    %5 = vector.shape_cast %4 : vector<16xf32> to vector<16x1xf32>
    %cst_5 = arith.constant 3.200000e+01 : f32
    %6 = vector.broadcast %cst_5 : f32 to vector<16x1xf32>
    %7 = arith.divf %5, %6 : vector<16x1xf32>
    %8 = vector.broadcast %7 : vector<16x1xf32> to vector<16x32xf32>
    %9 = arith.subf %1, %8 : vector<16x32xf32>
    %10 = arith.mulf %9, %9 : vector<16x32xf32>
    %cst_6 = arith.constant dense<0.000000e+00> : vector<16xf32>
    %11 = vector.multi_reduction <add>, %10, %cst_6 [1] : vector<16x32xf32> to vector<16xf32>
    %12 = vector.shape_cast %11 : vector<16xf32> to vector<16x1xf32>
    %cst_7 = arith.constant 3.100000e+01 : f32
    %13 = vector.broadcast %cst_7 : f32 to vector<16x1xf32>
    %14 = arith.divf %12, %13 : vector<16x1xf32>
    %15 = vector.broadcast %7 : vector<16x1xf32> to vector<16x32xf32>
    %16 = arith.subf %1, %15 : vector<16x32xf32>
    %17 = vector.broadcast %2 : vector<1x32xf32> to vector<16x32xf32>
    %18 = arith.mulf %17, %16 : vector<16x32xf32>
    %19 = math.sqrt %14 : vector<16x1xf32>
    %cst_8 = arith.constant 9.99999997E-7 : f32
    %20 = vector.broadcast %cst_8 : f32 to vector<16x1xf32>
    %21 = arith.addf %19, %20 : vector<16x1xf32>
    %22 = vector.broadcast %21 : vector<16x1xf32> to vector<16x32xf32>
    %23 = arith.divf %18, %22 : vector<16x32xf32>
    %24 = vector.broadcast %3 : vector<1x32xf32> to vector<16x32xf32>
    %25 = arith.addf %23, %24 : vector<16x32xf32>
    %26 = arith.truncf %25 : vector<16x32xf32> to vector<16x32xbf16>
    %c0_9 = arith.constant 0 : index
    %c0_10 = arith.constant 0 : index
    %27 = vector.load %arg4[%c0_9, %c0_10] : memref<32x128xbf16, #tpu.memory_space<vmem>>, vector<32x128xbf16>
    %cst_11 = arith.constant dense<0.000000e+00> : vector<16x128xf32>
    %28 = tpu.matmul %26, %27, %cst_11 {dimension_numbers = #tpu.dot_dimension_numbers<[1], [0], [0], [1], [0, 0, 1, 1], [], []>} : vector<16x32xbf16>, vector<32x128xbf16>, vector<16x128xf32> -> vector<16x128xf32>
    %c0_12 = arith.constant 0 : index
    %c0_13 = arith.constant 0 : index
    %29 = vector.load %arg5[%c0_12, %c0_13] : memref<1x128xf32, #tpu.memory_space<vmem>>, vector<1x128xf32>
    %30 = vector.broadcast %29 : vector<1x128xf32> to vector<16x128xf32>
    %31 = arith.addf %28, %30 : vector<16x128xf32>
    %c0_14 = arith.constant 0 : index
    %c0_15 = arith.constant 0 : index
    %32 = vector.load %arg6[%c0_14, %c0_15] : memref<16x128xf32, #tpu.memory_space<vmem>>, vector<16x128xf32>
    tpu.vector_store %arg6[%c0_14, %c0_15], %31 {strides = array<i32>} : memref<16x128xf32, #tpu.memory_space<vmem>>, vector<16x128xf32>,
    return
  }
  func.func @transform_0(%arg0: i32) -> (i32, i32) {
    %c0_i32 = arith.constant 0 : i32
    %c0_i32_0 = arith.constant 0 : i32
    return %arg0, %c0_i32 : i32, i32
  }
  func.func @transform_1(%arg0: i32) -> (i32, i32) {
    %c0_i32 = arith.constant 0 : i32
    %c0_i32_0 = arith.constant 0 : i32
    %c0_i32_1 = arith.constant 0 : i32
    return %c0_i32, %c0_i32_0 : i32, i32
  }
  func.func @transform_2(%arg0: i32) -> (i32, i32) {
    %c0_i32 = arith.constant 0 : i32
    %c0_i32_0 = arith.constant 0 : i32
    %c0_i32_1 = arith.constant 0 : i32
    return %c0_i32, %c0_i32_0 : i32, i32
  }
  func.func @transform_3(%arg0: i32) -> (i32, i32) {
    %c0_i32 = arith.constant 0 : i32
    %c0_i32_0 = arith.constant 0 : i32
    %c0_i32_1 = arith.constant 0 : i32
    return %c0_i32, %c0_i32_0 : i32, i32
  }
  func.func @transform_4(%arg0: i32) -> (i32, i32) {
    %c0_i32 = arith.constant 0 : i32
    %c0_i32_0 = arith.constant 0 : i32
    %c0_i32_1 = arith.constant 0 : i32
    return %c0_i32, %c0_i32_0 : i32, i32
  }
  func.func @transform_5(%arg0: i32) -> (i32, i32) {
    %c0_i32 = arith.constant 0 : i32
    %c0_i32_0 = arith.constant 0 : i32
    return %arg0, %c0_i32 : i32, i32
  }
}

</mosaic_0001>

<bundles_post_ra>
// kernel: transformer_seg_v2_forward.4
= control target key start
LH: loop header
LB: loop body
LE: loop exit
PB: predicated region body
PF: predicated region fallthrough
CT: control target
= control target key end

     0   :  { %v111_v0 = vmov 0.0   ;;  %vm112_vm0 = vmmov 0   ;;  %vm33_vm1 = vcmask 130048   ;;  %vm86_vm2 = vcmask 257024   ;;  %s151_s1 = inlined_call_operand.vmem [shape: bf16[16,32], index: 1, kind: input, shape index: {}]   ;;  %s152_s0 = inlined_call_operand.vmem [shape: f32[16,16], index: 0, kind: input, shape index: {}]   ;;  %s153_s2 = inlined_call_operand.vmem [shape: f32[1,32], index: 2, kind: input, shape index: {}]   ;;  %s154_s3 = inlined_call_operand.vmem [shape: bf16[16,32], index: 3, kind: output, shape index: {}]  }
   0x1   :  { %102 = vmatprep.subr.bf16.mxu0 %v111_v0  ;;  %v110_v1 = vld [vmem:[%s151_s1] sm:$0xff]   ;;  %104 = vmatprep.mubr.msk.bf16.mxu0 %vm112_vm0, %v111_v0  ;;  %v16_v3 = vld [vmem:[%s152_s0 + $0x8] sm:$0xff] }
   0x2   :  { %v15_v2 = vld [vmem:[%s152_s0] sm:$0xff]  ;;  %103 = vmatpush3.bf16.msra.mxu0 %v110_v1 }
   0x3   :  { %v17_v4 = vpack.c.bf16 %v16_v3, %v15_v2  ;;  %v93_v5 = vld [vmem:[%s153_s2] ss:$0 sm:$0xff] }
   0x5   :  { %105 = vmatmul.mubr.msk.bf16.vlgmr.msra.gmra.mrb[0].mxu0 %vm33_vm1, %v17_v4 }
  0xd8   :  { %v71_v6 = vpop.f32.mrb[0].mxu0 }
  0xd9   :  { %v72_v7 = vadd.f32 %v93_v5, %v71_v6  ;;  %v106_v8 = vpop.f32.mrb[1].mxu0 }
  0xda   :  { %v74_v9 = vpop.f32.mrb[2].mxu0 }
  0xdb   :  { %v98_v10 = vpack.c.bf16 %v72_v7, %v72_v7  ;;  %v75_v11 = vadd.f32 %v93_v5, %v74_v9  ;;  %v107_v12 = vpop.f32.mrb[3].mxu0 }
  0xdd   :  { %87 = vst.msk [vmem:[%s154_s3] sm:$0xf] %vm86_vm2, %v98_v10  ;;  %v99_v13 = vpack.c.bf16 %v75_v11, %v75_v11 }
  0xdf   :  { %88 = vst.msk [vmem:[%s154_s3 + $0x4] sm:$0xf] %vm86_vm2, %v99_v13 }

// kernel: transformer_seg_v2_forward.7
= control target key start
LH: loop header
LB: loop body
LE: loop exit
PB: predicated region body
PF: predicated region fallthrough
CT: control target
= control target key end

     0   :  { %vm27_vm0 = vcmask 261120   ;;  %v193_v15 = vmov 0.0   ;;  %vm194_vm1 = vmmov 0   ;;  %s254_s0 = inlined_call_operand.vmem [shape: bf16[16,32], index: 0, kind: input, shape index: {}]   ;;  %s255_s3 = inlined_call_operand.vmem [shape: bf16[32,128], index: 3, kind: input, shape index: {}]   ;;  %s256_s1 = inlined_call_operand.vmem [shape: f32[1,32], index: 1, kind: input, shape index: {}]   ;;  %s257_s2 = inlined_call_operand.vmem [shape: f32[1,32], index: 2, kind: input, shape index: {}]   ;;  %s258_s4 = inlined_call_operand.vmem [shape: f32[1,128], index: 4, kind: input, shape index: {}]   ;;  %s259_s5 = inlined_call_operand.vmem [shape: f32[16,128], index: 5, kind: output, shape index: {}]  }
   0x1   :  { %v167_v0 = vld [vmem:[%s254_s0] sm:$0xff]   ;;  %173 = vmatprep.subr.bf16.mxu0 %v193_v15  ;;  %177 = vmatprep.mubr.msk.bf16.mxu0 %vm194_vm1, %v193_v15  ;;  %v184_v17 = vld [vmem:[%s255_s3 + $0x8] sm:$0xff]  }
   0x2   :  { %v168_v1 = vunpack.c.l.bf16 %v167_v0  ;;  %v169_v2 = vunpack.c.h.bf16 %v167_v0  ;;  %v183_v16 = vld [vmem:[%s255_s3] sm:$0xff]  }
   0x3   :  { %174 = vmatpush3.bf16.msra.mxu0 %v183_v16  ;;  %v160_v34 = vld [vmem:[%s256_s1] ss:$0 sm:$0xff] }
   0x4   :  { %v28_v3 = vsel %vm27_vm0, %v168_v1, 0.0  ;;  %v31_v4 = vsel %vm27_vm0, %v169_v2, 0.0  ;;  %175 = vmatprep.subr.bf16.mxu0 %v193_v15  ;;  %v161_v40 = vld [vmem:[%s257_s2] ss:$0 sm:$0xff] }
   0x5   :  { %29 = vadd.xlane.f32.xlu0 %v28_v3  ;;  %v162_v45 = vld [vmem:[%s258_s4] ss:$0 sm:$0xff] }
   0x7   :  { %176 = vmatpush3.bf16.msra.mxu0 %v184_v17 }
   0x9   :  { %32 = vadd.xlane.f32.xlu0 %v31_v4 }
  0x92   :  { %v30_v5 = vpop.xlane.xlu0 %29 }
  0x93   :  { %v35_v6 = vmul.f32 0.03125, %v30_v5 }
  0x95   :  { %v37_v7 = vsub.f32 %v168_v1, %v35_v6 }
  0x96   :  { %v33_v8 = vpop.xlane.xlu0 %32 }
  0x97   :  { %v36_v9 = vmul.f32 0.03125, %v33_v8  ;;  %v39_v10 = vmul.f32 %v37_v7, %v37_v7  ;;  %v56_v36 = vmul.f32 %v160_v34, %v37_v7 }
  0x99   :  { %v38_v11 = vsub.f32 %v169_v2, %v36_v9  ;;  %v41_v12 = vsel %vm27_vm0, %v39_v10, 0.0 }
  0x9a   :  { %42 = vadd.xlane.f32.xlu1 %v41_v12 }
  0x9b   :  { %v40_v13 = vmul.f32 %v38_v11, %v38_v11  ;;  %v57_v37 = vmul.f32 %v160_v34, %v38_v11 }
  0x9d   :  { %v44_v14 = vsel %vm27_vm0, %v40_v13, 0.0 }
  0x9e   :  { %45 = vadd.xlane.f32.xlu1 %v44_v14 }
 0x127   :  { %v43_v18 = vpop.xlane.xlu1 %42 }
 0x128   :  { %v48_v19 = vmul.f32 0.032258064, %v43_v18 }
 0x12a   :  { %185 = vrsqrt.f32 %v48_v19  ;;  %vm60_vm2 = vcmp.eq.f32.partialorder %v48_v19, inf  ;;  %v63_v24 = vand.u32 2147483648, %v48_v19  ;;  %vm62_vm3 = vcmp.eq.f32.partialorder %v48_v19, 0.0 }
 0x12b   :  { %v46_v20 = vpop.xlane.xlu1 %45 }
 0x12c   :  { %v49_v21 = vmul.f32 0.032258064, %v46_v20 }
 0x12e   :  { %187 = vrsqrt.f32 %v49_v21  ;;  %vm67_vm4 = vcmp.eq.f32.partialorder %v49_v21, inf  ;;  %v70_v30 = vand.u32 2147483648, %v49_v21  ;;  %vm69_vm5 = vcmp.eq.f32.partialorder %v49_v21, 0.0 }
 0x134   :  { %v186_v22 = vpop.eup %185 }
 0x135   :  { %v59_v23 = vmul.f32 %v186_v22, %v48_v19 }
 0x137   :  { %v61_v25 = vsel %vm60_vm2, %v48_v19, %v59_v23 }
 0x138   :  { %v188_v26 = vpop.eup %187  ;;  %v64_v27 = vsel %vm62_vm3, %v63_v24, %v61_v25 }
 0x139   :  { %v72_v28 = vadd.f32 1e-06, %v64_v27  ;;  %v66_v29 = vmul.f32 %v188_v26, %v49_v21 }
 0x13b   :  { %189 = vrcp.f32 %v72_v28  ;;  %v68_v31 = vsel %vm67_vm4, %v49_v21, %v66_v29 }
 0x13c   :  { %v71_v32 = vsel %vm69_vm5, %v70_v30, %v68_v31 }
 0x13d   :  { %v73_v33 = vadd.f32 1e-06, %v71_v32 }
 0x13f   :  { %191 = vrcp.f32 %v73_v33 }
 0x145   :  { %v190_v35 = vpop.eup %189 }
 0x146   :  { %v75_v38 = vmul.f32 %v190_v35, %v56_v36 }
 0x148   :  { %v84_v42 = vadd.f32 %v161_v40, %v75_v38 }
 0x149   :  { %v192_v39 = vpop.eup %191 }
 0x14a   :  { %v77_v41 = vmul.f32 %v192_v39, %v57_v37 }
 0x14c   :  { %v85_v43 = vadd.f32 %v161_v40, %v77_v41 }
 0x14e   :  { %v86_v44 = vpack.c.bf16 %v85_v43, %v84_v42 }
 0x150   :  { %178 = vmatmul.mubr.msk.bf16.vlgmr.msra.gmra.mrb[0].mxu0 %vm27_vm0, %v86_v44 }
 0x223   :  { %v147_v46 = vpop.f32.mrb[0].mxu0 }
 0x224   :  { %v148_v47 = vadd.f32 %v162_v45, %v147_v46  ;;  %v179_v48 = vpop.f32.mrb[1].mxu0 }
 0x225   :  { %v150_v49 = vpop.f32.mrb[2].mxu0 }
 0x226   :  { %154 = vst [vmem:[%s259_s5] sm:$0xff] %v148_v47  ;;  %v151_v50 = vadd.f32 %v162_v45, %v150_v49  ;;  %v180_v51 = vpop.f32.mrb[3].mxu0 }
 0x228   :  { %155 = vst [vmem:[%s259_s5 + $0x8] sm:$0xff] %v151_v50 }

// kernel: transformer_seg_v2_forward.5
= control target key start
LH: loop header
LB: loop body
LE: loop exit
PB: predicated region body
PF: predicated region fallthrough
CT: control target
= control target key end

     0   :  { %s1696_s29 = smov 0   ;;  %s1871_s0 = inlined_call_operand.vmem [shape: bf16[2,8,32], index: 0, kind: input, shape index: {}]   ;;  %s1872_s1 = inlined_call_operand.vmem [shape: f32[2,1,8], index: 1, kind: input, shape index: {}]   ;;  %s1873_s2 = inlined_call_operand.vmem [shape: f32[1,32], index: 2, kind: input, shape index: {}]   ;;  %s1874_s3 = inlined_call_operand.vmem [shape: f32[1,32], index: 3, kind: input, shape index: {}]   ;;  %s1875_s4 = inlined_call_operand.vmem [shape: bf16[32,96], index: 4, kind: input, shape index: {}]   ;;  %s1876_s5 = inlined_call_operand.vmem [shape: f32[1,96], index: 5, kind: input, shape index: {}]   ;;  %s1877_s6 = inlined_call_operand.vmem [shape: bf16[32,32], index: 6, kind: input, shape index: {}]   ;;  %s1878_s7 = inlined_call_operand.vmem [shape: f32[1,32], index: 7, kind: input, shape index: {}]   ;;  %s1879_s8 = inlined_call_operand.vmem [shape: f32[1,32], index: 8, kind: input, shape index: {}]   ;;  %s1880_s9 = inlined_call_operand.vmem [shape: f32[1,32], index: 9, kind: input, shape index: {}]   ;;  %s1881_s10 = inlined_call_operand.vmem [shape: bf16[32,64], index: 10, kind: input, shape index: {}]   ;;  %s1882_s11 = inlined_call_operand.vmem [shape: f32[1,64], index: 11, kind: input, shape index: {}]   ;;  %s1883_s12 = inlined_call_operand.vmem [shape: bf16[64,32], index: 12, kind: input, shape index: {}]   ;;  %s1884_s13 = inlined_call_operand.vmem [shape: f32[1,32], index: 13, kind: input, shape index: {}]   ;;  %s1885_s14 = inlined_call_operand.vmem [shape: bf16[2,8,32], index: 14, kind: output, shape index: {}]  }
   0x1 LB: > { %s1384_s30 = sadd.s32 4294967295, %s1602_s29   ;;  %p1388_p0 = scmp.ge.s32.totalorder %s1602_s29, 1  ;;  %s1602_s29 = sphi %s1696_s29, %s24_s29  }
   0x2   : > { %p419_p1 = scmp.lt.s32.totalorder %s1602_s29, 3 }
   0x4   : > { %p420_p2 = pnand %p1388_p0, %p419_p1 }
   0x5   : > { %p466_p3 = scmp.lt.s32.totalorder (!%p420_p2), %s1384_s30, 1  ;;  %vm482_vm0 = vcmask (!%p420_p2), 261120   ;;  %v1562_v8 = vld [vmem:[%s1875_s4] sm:$0xff] (!%p420_p2)   ;;  %v1604_v9 = vmov (!%p420_p2), 0.0   ;;  %vm1605_vm1 = vmmov (!%p420_p2), 0   ;;  %v1563_v10 = vld [vmem:[%s1875_s4 + $0x8] sm:$0xff] (!%p420_p2)   ;;  %v642_v44 = vlaneseq (!%p420_p2) }
   0x6   : > { %423 = sbr.rel (%p420_p2) target bundleno = 2590 (0xa1e), region = 76  ;;  %1453 = vmatprep.subr.bf16.mxu0 (!%p420_p2), %v1604_v9  ;;  %1457 = vmatprep.mubr.msk.bf16.mxu0 (!%p420_p2), %vm1605_vm1, %v1604_v9  ;;  %v1391_v19 = vld [vmem:[%s1873_s2] ss:$0 sm:$0xff] (!%p420_p2)  ;;  %s1606_s16 = smov (!%p420_p2), 120   ;;  %vm593_vm4 = vcmask (!%p420_p2), 64512   ;;  %vm665_vm6 = vcmask (!%p420_p2), 1043456  }
   0x7   : > { %1454 = vmatpush3.bf16.msra.mxu0 (!%p420_p2), %v1562_v8  ;;  %1461 = vmatprep.subr.bf16.mxu1 (!%p420_p2), %v1604_v9  ;;  %v1392_v22 = vld [vmem:[%s1874_s3] ss:$0 sm:$0xff] (!%p420_p2)  ;;  %s1607_s17 = smov (!%p420_p2), 96   ;;  %s1609_s19 = smov (!%p420_p2), 80   ;;  %v643_v46 = vshrl.u32 (!%p420_p2), %v642_v44, 7  ;;  %vm1058_vm7 = vcmask (!%p420_p2), 130048  }
   0x8   : > { %1455 = vmatprep.subr.bf16.mxu0 (!%p420_p2), %v1604_v9  ;;  %1463 = vmatprep.mubr.msk.bf16.mxu1 (!%p420_p2), %vm1605_vm1, %v1604_v9  ;;  %v1393_v26 = vld [vmem:[%s1876_s5] ss:$0 sm:$0xff] (!%p420_p2)  ;;  %s1610_s20 = smov (!%p420_p2), 112   ;;  %s1611_s21 = smov (!%p420_p2), 72   ;;  %v1613_v48 = vmov (!%p420_p2), -1e+09  }
   0x9   : > { %s1612_s22 = smov (!%p420_p2), 104   ;;  %v644_v47 = vsub.s32 (!%p420_p2), 0, %v643_v46  ;;  %s1614_s26 = smov (!%p420_p2), 64   ;;  %vm1060_vm8 = vcmask (!%p420_p2), 195584   ;;  %vm1274_vm11 = vcmask (!%p420_p2), 523264   ;;  %vm1320_vm12 = vcmask (!%p420_p2), 257024  }
   0xa   : > { %s1615_s27 = smov (!%p420_p2), 56   ;;  %s1616_s28 = smov (!%p420_p2), 48  }
   0xb   : > { %1456 = vmatpush3.bf16.msra.mxu0 (!%p420_p2), %v1563_v10  ;;  %s1620_s23 = smov (!%p420_p2), 24  }
   0xc   : > { %1467 = vmatprep.subr.bf16.mxu0 (!%p420_p2), %v1604_v9 }
   0xd   : > { %s1887_s30 = smov (!%p466_p3, %s1384_s30), 1 }
   0xe   : > { %s1389_s15 = sshll.u32 %s1887_s30, 2  ;;  %s472_s25 = scalar_lea.vmem %s1872_s1, %s1887_s30 }
   0xf   : > { %s469_s18 = scalar_lea.vmem %s1871_s0, %s1389_s15  ;;  %v586_v45 = vld [vmem:[%s472_s25] sm:$0x1] }
  0x10   : > { %v478_v0 = vld [vmem:[%s469_s18] sm:$0xf]  ;;  %s1608_s18 = smov 88   ;;  %vm587_vm5 = vcmp.ne.f32.partialorder %v586_v45, 0.0 }
  0x11   : > { %v1712_v1 = vunpack.c.l.bf16 %v478_v0  ;;  %v588_v49 = vsel %vm587_vm5, 0.0, %v1613_v48 }
  0x12   : > { %v645_v50 = vrot.slane %v588_v49, %v644_v47 }
  0x13   : > { %v483_v2 = vsel %vm482_vm0, %v1712_v1, 0.0 }
  0x14   : > { %484 = vadd.xlane.f32.xlu0 %v483_v2 }
  0xa1   : > { %v485_v3 = vpop.xlane.xlu0 %484 }
  0xa2   : > { %v487_v4 = vmul.f32 0.03125, %v485_v3 }
  0xa4   : > { %v488_v5 = vsub.f32 %v1712_v1, %v487_v4 }
  0xa6   : > { %v489_v6 = vmul.f32 %v488_v5, %v488_v5  ;;  %v501_v20 = vmul.f32 %v1391_v19, %v488_v5 }
  0xa8   : > { %v490_v7 = vsel %vm482_vm0, %v489_v6, 0.0 }
  0xa9   : > { %491 = vadd.xlane.f32.xlu0 %v490_v7 }
 0x136   : > { %v492_v11 = vpop.xlane.xlu0 %491 }
 0x137   : > { %v494_v12 = vmul.f32 0.032258064, %v492_v11 }
 0x139   : > { %1572 = vrsqrt.f32 %v494_v12  ;;  %vm504_vm2 = vcmp.eq.f32.partialorder %v494_v12, inf  ;;  %v507_v15 = vand.u32 2147483648, %v494_v12  ;;  %vm506_vm3 = vcmp.eq.f32.partialorder %v494_v12, 0.0 }
 0x143   : > { %v1573_v13 = vpop.eup %1572 }
 0x144   : > { %v503_v14 = vmul.f32 %v1573_v13, %v494_v12 }
 0x146   : > { %v505_v16 = vsel %vm504_vm2, %v494_v12, %v503_v14 }
 0x147   : > { %v508_v17 = vsel %vm506_vm3, %v507_v15, %v505_v16 }
 0x148   : > { %v509_v18 = vadd.f32 1e-06, %v508_v17 }
 0x14a   : > { %1574 = vrcp.f32 %v509_v18 }
 0x154   : > { %v1575_v21 = vpop.eup %1574 }
 0x155   : > { %v511_v23 = vmul.f32 %v1575_v21, %v501_v20 }
 0x157   : > { %v518_v24 = vadd.f32 %v1392_v22, %v511_v23 }
 0x159   : > { %v519_v25 = vpack.c.bf16 %v518_v24, %v518_v24 }
 0x15b   : > { %1458 = vmatmul.mubr.msk.bf16.vlgmr.msra.gmra.mrb[0].mxu0 %vm482_vm0, %v519_v25 }
 0x15c   : > { %1469 = vmatprep.mubr.msk.bf16.mxu0 %vm1605_vm1, %v1604_v9 }
 0x22e   : > { %v580_v27 = vpop.f32.mrb[0].mxu0 }
 0x22f   : > { %v581_v28 = vadd.f32 %v1393_v26, %v580_v27  ;;  %v1459_v29 = vpop.f32.mrb[1].mxu0 }
 0x230   : > { %v583_v30 = vpop.f32.mrb[2].mxu0 }
 0x231   : > { %v1744_v31 = vpack.c.bf16 %v581_v28, %v581_v28  ;;  %v1460_v32 = vpop.f32.mrb[3].mxu0 }
 0x233   : > { %709 = vrot.lane.b32.xlu0 %v1744_v31, %s1606_s16  ;;  %591 = vrot.lane.b32.xlu1 %v1744_v31, %s1607_s17  ;;  %s1617_s16 = smov 40   ;;  %s1618_s17 = smov 8  }
 0x237   : > { %711 = vrot.lane.b32.xlu1 %v1744_v31, %s1608_s18 }
 0x23b   : > { %823 = vrot.lane.b32.xlu1 %v1744_v31, %s1609_s19 }
 0x23f   : > { %821 = vrot.lane.b32.xlu1 %v1744_v31, %s1610_s20 }
 0x243   : > { %935 = vrot.lane.b32.xlu1 %v1744_v31, %s1611_s21 }
 0x247   : > { %933 = vrot.lane.b32.xlu1 %v1744_v31, %s1612_s22  ;;  %s1619_s22 = smov 16  }
 0x2a5   : > { %v592_v33 = vpop.permute.xlu1 %591  ;;  %v710_v38 = vpop.permute.xlu0 %709 }
 0x2a6   : > { %v598_v34 = vsel %vm593_vm4, %v592_v33, 0 }
 0x2a7   : > { %1462 = vmatpush3.bf16.xpose.msra.mxu1 %v598_v34 }
 0x2a8   : > { %1473 = vmatprep.subr.bf16.mxu1 %v1604_v9 }
 0x2a9   : > { %v712_v35 = vpop.permute.xlu1 %711 }
 0x2aa   : > { %v717_v36 = vsel %vm593_vm4, %v712_v35, 0 }
 0x2ad   : > { %v824_v37 = vpop.permute.xlu1 %823 }
 0x2ae   : > { %1464 = vmatmul.mubr.msk.bf16.vlgmr.msra.gmra.mrb[0].mxu1 %vm593_vm4, %v1744_v31  ;;  %v829_v40 = vsel %vm593_vm4, %v824_v37, 0 }
 0x2af   : > { %1474 = vmatpush3.bf16.xpose.msra.mxu1 %v717_v36  ;;  %1475 = vmatprep.mubr.msk.bf16.mxu1 %vm1605_vm1, %v1604_v9 }
 0x2b0   : > { %1485 = vmatprep.subr.bf16.mxu1 %v1604_v9 }
 0x2b1   : > { %v822_v39 = vpop.permute.xlu1 %821 }
 0x2b5   : > { %v936_v41 = vpop.permute.xlu1 %935 }
 0x2b6   : > { %1476 = vmatmul.mubr.msk.bf16.vlgmr.msra.gmra.mrb[4].mxu1 %vm593_vm4, %v710_v38  ;;  %v941_v42 = vsel %vm593_vm4, %v936_v41, 0 }
 0x2b7   : > { %1486 = vmatpush3.bf16.xpose.msra.mxu1 %v829_v40  ;;  %1487 = vmatprep.mubr.msk.bf16.mxu1 %vm1605_vm1, %v1604_v9 }
 0x2b8   : > { %1497 = vmatprep.subr.bf16.mxu1 %v1604_v9 }
 0x2b9   : > { %v934_v43 = vpop.permute.xlu1 %933 }
 0x2be   : > { %1488 = vmatmul.mubr.msk.bf16.vlgmr.msra.gmra.mrb[8].mxu1 %vm593_vm4, %v822_v39 }
 0x2bf   : > { %1498 = vmatpush3.bf16.xpose.msra.mxu1 %v941_v42  ;;  %1499 = vmatprep.mubr.msk.bf16.mxu1 %vm1605_vm1, %v1604_v9 }
 0x2c0   : > { %1509 = vmatprep.subr.bf16.mxu1 %v1604_v9 }
 0x2c6   : > { %1500 = vmatmul.mubr.msk.bf16.vlgmr.msra.gmra.mrb[12].mxu1 %vm593_vm4, %v934_v43 }
 0x2c7   : > { %1513 = vmatprep.mubr.msk.bf16.mxu1 %vm1605_vm1, %v1604_v9 }
 0x381   : > { %v634_v51 = vpop.f32.mrb[0].mxu1 }
 0x382   : > { %v640_v52 = vmul.f32 0.35355338, %v634_v51  ;;  %v1465_v53 = vpop.f32.mrb[1].mxu1 }
 0x383   : > { %v637_v54 = vpop.f32.mrb[2].mxu1 }
 0x384   : > { %v1466_v55 = vpop.f32.mrb[3].mxu1  ;;  %v647_v56 = vadd.f32 %v645_v50, %v640_v52 }
 0x386   : > { %v648_v57 = vsel %vm593_vm4, %v647_v56, -inf }
 0x387   : > { %649 = vmax.xlane.f32.xlu1 %v648_v57 }
 0x389   : > { %v753_v58 = vpop.f32.mrb[4].mxu1 }
 0x38a   : > { %v759_v59 = vmul.f32 0.35355338, %v753_v58  ;;  %v1477_v60 = vpop.f32.mrb[5].mxu1 }
 0x38b   : > { %v756_v61 = vpop.f32.mrb[6].mxu1 }
 0x38c   : > { %v1478_v62 = vpop.f32.mrb[7].mxu1  ;;  %v760_v63 = vadd.f32 %v759_v59, %v645_v50 }
 0x38e   : > { %v761_v0 = vsel %vm593_vm4, %v760_v63, -inf }
 0x38f   : > { %762 = vmax.xlane.f32.xlu0 %v761_v0 }
 0x391   : > { %v865_v2 = vpop.f32.mrb[8].mxu1 }
 0x392   : > { %v871_v3 = vmul.f32 0.35355338, %v865_v2  ;;  %v1489_v4 = vpop.f32.mrb[9].mxu1 }
 0x393   : > { %v868_v5 = vpop.f32.mrb[10].mxu1 }
 0x394   : > { %v1490_v6 = vpop.f32.mrb[11].mxu1  ;;  %v872_v7 = vadd.f32 %v871_v3, %v645_v50 }
 0x395   : > { %v1564_v6 = vld [vmem:[%s1877_s6] sm:$0xff]  }
 0x396   : > { %v873_v8 = vsel %vm593_vm4, %v872_v7, -inf  ;;  %1510 = vmatpush3.bf16.msra.mxu1 %v1564_v6 }
 0x397   : > { %874 = vmax.xlane.f32.xlu1 %v873_v8  ;;  %1511 = vmatprep.subr.bf16.mxu1 %v1604_v9 }
 0x399   : > { %v977_v10 = vpop.f32.mrb[12].mxu1 }
 0x39a   : > { %v983_v11 = vmul.f32 0.35355338, %v977_v10  ;;  %v1501_v12 = vpop.f32.mrb[13].mxu1 }
 0x39b   : > { %v980_v13 = vpop.f32.mrb[14].mxu1 }
 0x39c   : > { %v1502_v14 = vpop.f32.mrb[15].mxu1  ;;  %v984_v15 = vadd.f32 %v983_v11, %v645_v50 }
 0x39e   : > { %v985_v16 = vsel %vm593_vm4, %v984_v15, -inf }
 0x39f   : > { %986 = vmax.xlane.f32.xlu0 %v985_v16 }
 0x414   : > { %v650_v17 = vpop.xlane.xlu1 %649 }
 0x415   : > { %v651_v18 = vsub.f32 %v647_v56, %v650_v17 }
 0x417   : > { %v652_v19 = vmul.f32 1.442695, %v651_v18 }
 0x419   : > { %1576 = vpow2.f32 %v652_v19 }
 0x41c   : > { %v763_v20 = vpop.xlane.xlu0 %762 }
 0x41d   : > { %v764_v21 = vsub.f32 %v760_v63, %v763_v20 }
 0x41f   : > { %v765_v22 = vmul.f32 1.442695, %v764_v21 }
 0x421   : > { %1578 = vpow2.f32 %v765_v22 }
 0x423   : > { %v1577_v23 = vpop.eup %1576 }
 0x424   : > { %v654_v24 = vsel %vm593_vm4, %v1577_v23, 0.0  ;;  %v875_v33 = vpop.xlane.xlu1 %874 }
 0x425   : > { %655 = vadd.xlane.f32.xlu1 %v654_v24  ;;  %v876_v34 = vsub.f32 %v872_v7, %v875_v33  ;;  %v1565_v7 = vld [vmem:[%s1877_s6 + $0x8] sm:$0xff]   ;;  %v1405_v24 = vld [vmem:[%s1878_s7] ss:$0 sm:$0xff] }
 0x426   : > { %1512 = vmatpush3.bf16.msra.mxu1 %v1565_v7 }
 0x427   : > { %v877_v35 = vmul.f32 1.442695, %v876_v34  ;;  %1525 = vmatprep.subr.bf16.mxu1 %v1604_v9 }
 0x42b   : > { %v1579_v25 = vpop.eup %1578 }
 0x42c   : > { %v987_v26 = vpop.xlane.xlu0 %986  ;;  %v767_v27 = vsel %vm593_vm4, %v1579_v25, 0.0 }
 0x42d   : > { %v988_v28 = vsub.f32 %v984_v15, %v987_v26  ;;  %768 = vadd.xlane.f32.xlu0 %v767_v27 }
 0x42f   : > { %v989_v29 = vmul.f32 1.442695, %v988_v28 }
 0x431   : > { %1580 = vpow2.f32 %v989_v29 }
 0x432   : > { %1582 = vpow2.f32 %v877_v35 }
 0x436   : > { %660 = vrot.lane.b32.xlu1 %v1744_v31, %s1614_s26 }
 0x43b   : > { %v1581_v30 = vpop.eup %1580 }
 0x43c   : > { %v991_v32 = vsel %vm593_vm4, %v1581_v30, 0.0  ;;  %v1583_v36 = vpop.eup %1582 }
 0x43d   : > { %992 = vadd.xlane.f32.xlu0 %v991_v32  ;;  %v879_v37 = vsel %vm593_vm4, %v1583_v36, 0.0 }
 0x453   : > { %773 = vrot.lane.b32.xlu0 %v1744_v31, %s1615_s27 }
 0x45a   : > { %880 = vadd.xlane.f32.xlu1 %v879_v37 }
 0x46b   : > { %885 = vrot.lane.b32.xlu1 %v1744_v31, %s1616_s28 }
 0x46f   : > { %997 = vrot.lane.b32.xlu1 %v1744_v31, %s1617_s16 }
 0x4b2   : > { %v656_v38 = vpop.xlane.xlu1 %655 }
 0x4b3   : > { %1584 = vrcp.f32 %v656_v38  ;;  %v1566_v38 = vld [vmem:[%s1881_s10] sm:$0xff]  }
 0x4b6   : > { %v661_v39 = vpop.permute.xlu1 %660 }
 0x4b7   : > { %v667_v40 = vsel %vm665_vm6, %v661_v39, 0  ;;  %v1568_v39 = vld [vmem:[%s1883_s12] sm:$0xff]  }
 0x4b8   : > { %1468 = vmatpush3.bf16.msra.mxu0 %v667_v40  ;;  %v1569_v40 = vld [vmem:[%s1883_s12 + $0x8] sm:$0xff]  }
 0x4b9   : > { %1479 = vmatprep.subr.bf16.mxu0 %v1604_v9 }
 0x4ba   : > { %v769_v42 = vpop.xlane.xlu0 %768 }
 0x4bb   : > { %1586 = vrcp.f32 %v769_v42 }
 0x4bd   : > { %v1585_v41 = vpop.eup %1584 }
 0x4be   : > { %v658_v43 = vmul.f32 %v1585_v41, %v1577_v23 }
 0x4c0   : > { %v659_v44 = vpack.c.bf16 %v658_v43, %v658_v43 }
 0x4c2   : > { %1470 = vmatmul.mubr.msk.bf16.vlgmr.msra.gmra.mrb[4].mxu0 %vm593_vm4, %v659_v44 }
 0x4c3   : > { %1481 = vmatprep.mubr.msk.bf16.mxu0 %vm1605_vm1, %v1604_v9 }
 0x4c5   : > { %v1587_v31 = vpop.eup %1586 }
 0x4c6   : > { %v771_v46 = vmul.f32 %v1587_v31, %v1579_v25 }
 0x4c8   : > { %v772_v49 = vpack.c.bf16 %v771_v46, %v771_v46 }
 0x4ca   : > { %v993_v45 = vpop.xlane.xlu0 %992 }
 0x4ce   : > { %v774_v47 = vpop.permute.xlu0 %773 }
 0x4cf   : > { %v779_v48 = vsel %vm665_vm6, %v774_v47, 0 }
 0x4d0   : > { %1480 = vmatpush3.bf16.msra.mxu0 %v779_v48  ;;  %v1409_v48 = vld [vmem:[%s1879_s8] ss:$0 sm:$0xff] }
 0x4d1   : > { %1491 = vmatprep.subr.bf16.mxu0 %v1604_v9 }
 0x4d3   : > { %1482 = vmatmul.mubr.msk.bf16.vlgmr.msra.gmra.mrb[8].mxu0 %vm593_vm4, %v772_v49 }
 0x4d4   : > { %1493 = vmatprep.mubr.msk.bf16.mxu0 %vm1605_vm1, %v1604_v9 }
 0x4e7   : > { %v881_v50 = vpop.xlane.xlu1 %880 }
 0x4e8   : > { %1588 = vrcp.f32 %v881_v50 }
 0x4e9   : > { %1590 = vrcp.f32 %v993_v45 }
 0x4eb   : > { %v886_v51 = vpop.permute.xlu1 %885 }
 0x4ec   : > { %v891_v52 = vsel %vm665_vm6, %v886_v51, 0  ;;  %v1410_v51 = vld [vmem:[%s1880_s9] ss:$0 sm:$0xff] }
 0x4ed   : > { %1492 = vmatpush3.bf16.msra.mxu0 %v891_v52 }
 0x4ee   : > { %1503 = vmatprep.subr.bf16.mxu0 %v1604_v9 }
 0x4ef   : > { %v998_v55 = vpop.permute.xlu1 %997 }
 0x4f0   : > { %v1003_v58 = vsel %vm665_vm6, %v998_v55, 0  ;;  %v1570_v55 = vld [vmem:[%s1883_s12 + $0x10] sm:$0xff]  }
 0x4f2   : > { %v1589_v53 = vpop.eup %1588 }
 0x4f3   : > { %v883_v54 = vmul.f32 %v1589_v53, %v1583_v36  ;;  %v1591_v57 = vpop.eup %1590 }
 0x4f4   : > { %v995_v59 = vmul.f32 %v1591_v57, %v1581_v30  ;;  %v1411_v57 = vld [vmem:[%s1882_s11] ss:$0 sm:$0xff] }
 0x4f5   : > { %v884_v56 = vpack.c.bf16 %v883_v54, %v883_v54 }
 0x4f6   : > { %v996_v60 = vpack.c.bf16 %v995_v59, %v995_v59 }
 0x4f7   : > { %1494 = vmatmul.mubr.msk.bf16.vlgmr.msra.gmra.mrb[12].mxu0 %vm593_vm4, %v884_v56  ;;  %v1571_v56 = vld [vmem:[%s1883_s12 + $0x18] sm:$0xff]  }
 0x4f8   : > { %1504 = vmatpush3.bf16.msra.mxu0 %v1003_v58  ;;  %1505 = vmatprep.mubr.msk.bf16.mxu0 %vm1605_vm1, %v1604_v9 }
 0x4f9   : > { %1517 = vmatprep.subr.bf16.mxu0 %v1604_v9 }
 0x4ff   : > { %1506 = vmatmul.mubr.msk.bf16.vlgmr.msra.gmra.mrb[16].mxu0 %vm593_vm4, %v996_v60 }
 0x500   : > { %1521 = vmatprep.mubr.msk.bf16.mxu0 %vm1605_vm1, %v1604_v9  ;;  %1518 = vmatpush3.bf16.msra.mxu0 %v1566_v38 }
 0x501   : > { %1519 = vmatprep.subr.bf16.mxu0 %v1604_v9 }
 0x595   : > { %v703_v61 = vpop.f32.mrb[4].mxu0 }
 0x596   : > { %v1471_v62 = vpop.f32.mrb[5].mxu0 }
 0x597   : > { %v706_v63 = vpop.f32.mrb[6].mxu0 }
 0x598   : > { %v1472_v0 = vpop.f32.mrb[7].mxu0 }
 0x5a6   : > { %v815_v2 = vpop.f32.mrb[8].mxu0 }
 0x5a7   : > { %1046 = vrot.lane.b32.xlu0 %v815_v2, %s1618_s17  ;;  %v1483_v3 = vpop.f32.mrb[9].mxu0 }
 0x5a8   : > { %v818_v4 = vpop.f32.mrb[10].mxu0 }
 0x5a9   : > { %v1484_v5 = vpop.f32.mrb[11].mxu0 }
 0x5ca   : > { %v927_v8 = vpop.f32.mrb[12].mxu0 }
 0x5cb   : > { %1050 = vrot.lane.b32.xlu1 %v927_v8, %s1619_s22  ;;  %v1495_v10 = vpop.f32.mrb[13].mxu0  ;;  %s476_s22 = scalar_lea.vmem %s1885_s14, %s1389_s15 }
 0x5cc   : > { %v930_v11 = vpop.f32.mrb[14].mxu0 }
 0x5cd   : > { %v1496_v12 = vpop.f32.mrb[15].mxu0 }
 0x5d2   : > { %v1039_v13 = vpop.f32.mrb[16].mxu0 }
 0x5d3   : > { %1054 = vrot.lane.b32.xlu0 %v1039_v13, %s1620_s23  ;;  %v1507_v14 = vpop.f32.mrb[17].mxu0 }
 0x5d4   : > { %v1042_v15 = vpop.f32.mrb[18].mxu0 }
 0x5d5   : > { %v1508_v16 = vpop.f32.mrb[19].mxu0 }
 0x619   : > { %v1047_v17 = vpop.permute.xlu0 %1046 }
 0x61a   : > { %v1057_v19 = vsel %vm593_vm4, %v703_v61, %v1047_v17 }
 0x63d   : > { %v1051_v18 = vpop.permute.xlu1 %1050 }
 0x63e   : > { %v1059_v20 = vsel %vm1058_vm7, %v1057_v19, %v1051_v18 }
 0x645   : > { %v1055_v21 = vpop.permute.xlu0 %1054 }
 0x646   : > { %v1061_v22 = vsel %vm1060_vm8, %v1059_v20, %v1055_v21 }
 0x647   : > { %v1062_v23 = vpack.c.bf16 %v1061_v22, %v1061_v22 }
 0x649   : > { %1514 = vmatmul.mubr.msk.bf16.vlgmr.msra.gmra.mrb[16].mxu1 %vm482_vm0, %v1062_v23 }
 0x64a   : > { %1533 = vmatprep.mubr.msk.bf16.mxu1 %vm1605_vm1, %v1604_v9  ;;  %1526 = vmatpush3.bf16.msra.mxu1 %v1568_v39 }
 0x64b   : > { %1527 = vmatprep.subr.bf16.mxu1 %v1604_v9 }
 0x64e   : > { %1528 = vmatpush3.bf16.msra.mxu1 %v1569_v40 }
 0x64f   : > { %1529 = vmatprep.subr.bf16.mxu1 %v1604_v9 }
 0x652   : > { %1530 = vmatpush3.bf16.msra.mxu1 %v1570_v55 }
 0x653   : > { %1531 = vmatprep.subr.bf16.mxu1 %v1604_v9  ;;  %v1415_v9 = vld [vmem:[%s1884_s13] ss:$0 sm:$0xff] }
 0x656   : > { %1532 = vmatpush3.bf16.msra.mxu1 %v1571_v56 }
 0x71c   : > { %v1123_v25 = vpop.f32.mrb[16].mxu1 }
 0x71d   : > { %v1124_v26 = vadd.f32 %v1405_v24, %v1123_v25  ;;  %v1515_v27 = vpop.f32.mrb[17].mxu1 }
 0x71e   : > { %v1126_v28 = vpop.f32.mrb[18].mxu1 }
 0x71f   : > { %v1129_v29 = vadd.f32 %v1124_v26, %v1712_v1  ;;  %v1516_v30 = vpop.f32.mrb[19].mxu1  ;;  %v1567_v1 = vld [vmem:[%s1881_s10 + $0x8] sm:$0xff]  }
 0x720   : > { %1520 = vmatpush3.bf16.msra.mxu0 %v1567_v1 }
 0x721   : > { %v1132_v32 = vsel %vm482_vm0, %v1129_v29, 0.0 }
 0x722   : > { %1133 = vadd.xlane.f32.xlu1 %v1132_v32 }
 0x7af   : > { %v1134_v33 = vpop.xlane.xlu1 %1133 }
 0x7b0   : > { %v1135_v34 = vmul.f32 0.03125, %v1134_v33 }
 0x7b2   : > { %v1136_v35 = vsub.f32 %v1129_v29, %v1135_v34 }
 0x7b4   : > { %v1137_v36 = vmul.f32 %v1136_v35, %v1136_v35  ;;  %v1148_v49 = vmul.f32 %v1409_v48, %v1136_v35 }
 0x7b6   : > { %v1138_v37 = vsel %vm482_vm0, %v1137_v36, 0.0 }
 0x7b7   : > { %1139 = vadd.xlane.f32.xlu0 %v1138_v37 }
 0x844   : > { %v1140_v41 = vpop.xlane.xlu0 %1139 }
 0x845   : > { %v1141_v42 = vmul.f32 0.032258064, %v1140_v41 }
 0x847   : > { %1592 = vrsqrt.f32 %v1141_v42  ;;  %vm1151_vm9 = vcmp.eq.f32.partialorder %v1141_v42, inf  ;;  %v1154_v31 = vand.u32 2147483648, %v1141_v42  ;;  %vm1153_vm10 = vcmp.eq.f32.partialorder %v1141_v42, 0.0 }
 0x851   : > { %v1593_v43 = vpop.eup %1592 }
 0x852   : > { %v1150_v44 = vmul.f32 %v1593_v43, %v1141_v42 }
 0x854   : > { %v1152_v45 = vsel %vm1151_vm9, %v1141_v42, %v1150_v44 }
 0x855   : > { %v1155_v46 = vsel %vm1153_vm10, %v1154_v31, %v1152_v45 }
 0x856   : > { %v1156_v47 = vadd.f32 1e-06, %v1155_v46 }
 0x858   : > { %1594 = vrcp.f32 %v1156_v47 }
 0x862   : > { %v1595_v50 = vpop.eup %1594 }
 0x863   : > { %v1158_v52 = vmul.f32 %v1595_v50, %v1148_v49 }
 0x865   : > { %v1165_v53 = vadd.f32 %v1410_v51, %v1158_v52 }
 0x867   : > { %v1166_v54 = vpack.c.bf16 %v1165_v53, %v1165_v53 }
 0x869   : > { %1522 = vmatmul.mubr.msk.bf16.vlgmr.msra.gmra.mrb[20].mxu0 %vm482_vm0, %v1166_v54 }
 0x93c   : > { %v1227_v58 = vpop.f32.mrb[20].mxu0 }
 0x93d   : > { %v1228_v59 = vadd.f32 %v1411_v57, %v1227_v58  ;;  %v1523_v60 = vpop.f32.mrb[21].mxu0 }
 0x93e   : > { %v1230_v61 = vpop.f32.mrb[22].mxu0 }
 0x93f   : > { %v1233_v62 = vmax.f32 %v1228_v59, 0.0  ;;  %v1524_v63 = vpop.f32.mrb[23].mxu0 }
 0x941   : > { %v1234_v0 = vpack.c.bf16 %v1233_v62, %v1233_v62 }
 0x943   : > { %1534 = vmatmul.mubr.msk.bf16.vlgmr.msra.gmra.mrb[20].mxu1 %vm1274_vm11, %v1234_v0 }
 0xa16   : > { %v1312_v2 = vpop.f32.mrb[20].mxu1 }
 0xa17   : > { %v1313_v3 = vadd.f32 %v1415_v9, %v1312_v2  ;;  %v1535_v4 = vpop.f32.mrb[21].mxu1 }
 0xa18   : > { %v1315_v5 = vpop.f32.mrb[22].mxu1 }
 0xa19   : > { %v1318_v6 = vadd.f32 %v1313_v3, %v1129_v29  ;;  %v1536_v7 = vpop.f32.mrb[23].mxu1 }
 0xa1b   : > { %v1319_v8 = vpack.c.bf16 %v1318_v6, %v1318_v6 }
 0xa1d   : > { %1321 = vst.msk [vmem:[%s476_s22] sm:$0xf] %vm1320_vm12, %v1319_v8 }
 0xa1e PF: > { %s24_s29 = sadd.s32 1, %s1602_s29  }
 0xa1f   : > { %p21_p4 = scmp.ge.s32.totalorder %s24_s29, 4  }
 0xa21   :  { %23 = sbr.rel (!%p21_p4) target bundleno = 1 (0x1), region = 109 }

</bundles_post_ra>
